<compile_context>
chip_gen: v6e
topology: v6e:2x2x1
jax: 0.10.0
libtpu: 0.0.40
codegen_flags: <defaults>
</compile_context>

<pallas_src>
import math

import jax
import jax.numpy as jnp
from jax.experimental import pallas as pl
from jax.experimental.pallas import tpu as pltpu


def _pick_tile(dim, pref, align):
    """Largest power-of-two tile <= pref that divides dim (>= align), else dim."""
    t = pref
    while t >= align:
        if t <= dim and dim % t == 0:
            return t
        t //= 2
    return dim


def _vmem_limit(block_bytes, scratch_bytes=0):
    # double-buffered blocks + scratch + slack; stays < 64 MiB (v7x physical)
    # and < 128 MiB (v5e/v6e physical).
    est = 2 * block_bytes + scratch_bytes + (4 << 20)
    return int(min(max(est, 32 << 20), 48 << 20))


# ---------------------------------------------------------------------------
# Kernel A: tiled matmul + bias (f32 accumulate).  Used for the input->gates
# projection and for the FC classifier head.
# ---------------------------------------------------------------------------
def _matmul_bias_kernel(x_ref, w_ref, b_ref, o_ref, acc_ref):
    @pl.when(pl.program_id(2) == 0)
    def _():
        acc_ref[...] = jnp.zeros_like(acc_ref)

    acc_ref[...] += jnp.dot(x_ref[...], w_ref[...],
                            preferred_element_type=jnp.float32)

    @pl.when(pl.program_id(2) == pl.num_programs(2) - 1)
    def _():
        o_ref[...] = (acc_ref[...] + b_ref[...]).astype(o_ref.dtype)


def _matmul_bias(lhs, rhs, bias, out_dtype=jnp.float32):
    """(M, K) @ (K, N) + (1, N), tiled over (M, N, K) and pipelined over K."""
    M, K = lhs.shape
    Kr, N = rhs.shape
    assert K == Kr
    tm = _pick_tile(M, 256, 8)
    tn = _pick_tile(N, 512, 128)
    tk = _pick_tile(K, 512, 128)
    grid = (M // tm, N // tn, K // tk)

    out_size = jnp.dtype(out_dtype).itemsize
    block_bytes = (tm * tk * lhs.dtype.itemsize + tk * tn * rhs.dtype.itemsize
                   + tn * bias.dtype.itemsize + tm * tn * out_size)
    scratch_bytes = tm * tn * 4

    return pl.pallas_call(
        _matmul_bias_kernel,
        out_shape=jax.ShapeDtypeStruct((M, N), out_dtype),
        grid_spec=pltpu.PrefetchScalarGridSpec(
            num_scalar_prefetch=0,
            grid=grid,
            in_specs=[
                pl.BlockSpec((tm, tk), lambda i, j, k: (i, k)),
                pl.BlockSpec((tk, tn), lambda i, j, k: (k, j)),
                pl.BlockSpec((1, tn), lambda i, j, k: (0, j)),
            ],
            out_specs=pl.BlockSpec((tm, tn), lambda i, j, k: (i, j)),
            scratch_shapes=[pltpu.VMEM((tm, tn), jnp.float32)],
        ),
        compiler_params=pltpu.CompilerParams(
            dimension_semantics=("parallel", "parallel", "arbitrary"),
            vmem_limit_bytes=_vmem_limit(block_bytes, scratch_bytes)),
    )(lhs, rhs, bias)


# ---------------------------------------------------------------------------
# Kernel B: serial GRU recurrence (the only truly sequential part).
# ---------------------------------------------------------------------------
def _gru_recurrence_kernel(gi_ref, whh_ref, bhh_ref, h_ref):
    """GRU over T steps for one batch block.

    gi_ref  : (T, B, 3H) f32   precomputed x_t @ W_ih^T + b_ih
    whh_ref : (H, 3H)    bf16  hidden->gates weights (transposed)
    bhh_ref : (1, 3H)    f32   hidden bias
    h_ref   : (T, B, H)  f32   per-step hidden states (output)
    Gate order matches torch.nn.GRU: [r | z | n].
    """
    T, B, TH = gi_ref.shape
    H = TH // 3

    # Hoist the bias broadcast out of the loop (JAX does not CSE broadcasts).
    bhh = jnp.broadcast_to(bhh_ref[...], (B, TH))

    def step(t, h):
        gi = gi_ref[t]                                           # (B, 3H) f32
        gh = jnp.dot(h.astype(jnp.bfloat16), whh_ref[...],
                     preferred_element_type=jnp.float32) + bhh   # (B, 3H)
        r = jax.nn.sigmoid(gi[:, :H] + gh[:, :H])
        z = jax.nn.sigmoid(gi[:, H:2 * H] + gh[:, H:2 * H])
        n = jnp.tanh(gi[:, 2 * H:] + r * gh[:, 2 * H:])
        h_new = (1.0 - z) * n + z * h
        h_ref[t] = h_new
        return h_new

    # Unrolled: lets the LLO scheduler overlap MXU push / EUP / VPU / stores of
    # adjacent timesteps (the recurrence is the latency-bound critical path).
    jax.lax.fori_loop(0, T, step, jnp.zeros((B, H), jnp.float32), unroll=True)


def _gru_recurrence(gi, whh_t, bhh):
    T, Bp, TH = gi.shape
    H = TH // 3
    # Split the (independent) batch rows across 2 programs when they tile
    # cleanly -> v7x megacore runs the two halves in parallel (no-op on 1-TC).
    nb = 2 if (Bp >= 16 and (Bp // 2) % 8 == 0) else 1
    bb = Bp // nb

    block_bytes = T * bb * TH * 4 + H * TH * 2 + TH * 4 + T * bb * H * 4

    return pl.pallas_call(
        _gru_recurrence_kernel,
        out_shape=jax.ShapeDtypeStruct((T, Bp, H), jnp.float32),
        grid_spec=pltpu.PrefetchScalarGridSpec(
            num_scalar_prefetch=0,
            grid=(nb,),
            in_specs=[
                pl.BlockSpec((T, bb, TH), lambda b: (0, b, 0)),
                pl.BlockSpec((H, TH), lambda b: (0, 0)),
                pl.BlockSpec((1, TH), lambda b: (0, 0)),
            ],
            out_specs=pl.BlockSpec((T, bb, H), lambda b: (0, b, 0)),
        ),
        compiler_params=pltpu.CompilerParams(
            dimension_semantics=("parallel",),
            vmem_limit_bytes=_vmem_limit(block_bytes)),
    )(gi, whh_t, bhh)


# ---------------------------------------------------------------------------
# Wrapper: RecurrentClassifier.forward (inference; dropout = identity).
# ---------------------------------------------------------------------------
def recurrent_classifier_forward(feature, params):
    """feature: (B, T, F) float32 -> (logits (B*T, C), last_out (B, C))."""
    W_ih, W_hh, b_ih, b_hh, W_fc, b_fc = params
    B, T, F = feature.shape
    H = W_hh.shape[1]
    C = W_fc.shape[0]
    TH = 3 * H
    Cp = ((C + 127) // 128) * 128        # lane-dense class dim
    Bp = ((B + 7) // 8) * 8              # full-sublane batch

    # ---- glue (plain JAX): layout plumbing + bf16 casts only ----
    xp = feature.astype(jnp.float32)
    if Bp != B:
        xp = jnp.pad(xp, ((0, Bp - B), (0, 0), (0, 0)))
    x_tbf = jnp.transpose(xp, (1, 0, 2)).astype(jnp.bfloat16)        # (T, Bp, F)

    wih_t = jnp.transpose(W_ih).astype(jnp.bfloat16)                 # (F, 3H)
    whh_t = jnp.transpose(W_hh).astype(jnp.bfloat16)                 # (H, 3H)
    wfc_t = jnp.pad(jnp.transpose(W_fc).astype(jnp.bfloat16),
                    ((0, 0), (0, Cp - C)))                           # (H, Cp)
    bih2 = b_ih.reshape(1, TH).astype(jnp.float32)
    bhh2 = b_hh.reshape(1, TH).astype(jnp.float32)
    bfc2 = jnp.pad(b_fc.reshape(1, C).astype(jnp.float32),
                   ((0, 0), (0, Cp - C)))                            # (1, Cp)

    # 1) input->gates projection, hoisted out of the serial loop.
    gi = _matmul_bias(x_tbf.reshape(T * Bp, F), wih_t, bih2)         # (T*Bp, 3H) f32
    gi = gi.reshape(T, Bp, TH)

    # 2) serial GRU recurrence (only the hidden->gates matmul remains inside).
    h_all = _gru_recurrence(gi, whh_t, bhh2)                         # (T, Bp, H) f32

    # 3) FC head as one batched matmul over all timesteps (lane-padded C).
    logits2d = _matmul_bias(h_all.reshape(T * Bp, H).astype(jnp.bfloat16),
                            wfc_t, bfc2)                             # (T*Bp, Cp) f32

    logits_btc = jnp.transpose(logits2d.reshape(T, Bp, Cp), (1, 0, 2))[:B, :, :C]
    logits = logits_btc.reshape(B * T, C)
    last_out = logits_btc[:, -1, :]      # == fc(h_T); no duplicate matmul
    return logits, last_out


# ---------------------------------------------------------------------------
# Pure-JAX reference (mirrors torch.nn.GRU + nn.Linear semantics, f32).
# ---------------------------------------------------------------------------
def reference_forward(feature, params):
    W_ih, W_hh, b_ih, b_hh, W_fc, b_fc = params
    B, T, F = feature.shape
    H = W_hh.shape[1]

    def cell(h, x_t):
        gi = x_t @ W_ih.T + b_ih
        gh = h @ W_hh.T + b_hh
        r = jax.nn.sigmoid(gi[:, 0:H] + gh[:, 0:H])
        z = jax.nn.sigmoid(gi[:, H:2 * H] + gh[:, H:2 * H])
        n = jnp.tanh(gi[:, 2 * H:3 * H] + r * gh[:, 2 * H:3 * H])
        h_new = (1.0 - z) * n + z * h
        return h_new, h_new

    h0 = jnp.zeros((B, H), jnp.float32)
    _, outs = jax.lax.scan(cell, h0, jnp.transpose(feature, (1, 0, 2)))
    out = jnp.transpose(outs, (1, 0, 2))                      # (B, T, H)
    logits = out.reshape(B * T, H) @ W_fc.T + b_fc
    last_out = logits.reshape(B, T, -1)[:, -1, :].reshape(B, -1)
    return logits, last_out


def init_params(key, input_dim, hidden_dim, num_classes):
    """PyTorch-style U(-1/sqrt(H), 1/sqrt(H)) init."""
    ks = jax.random.split(key, 6)
    bound = 1.0 / math.sqrt(hidden_dim)
    W_ih = jax.random.uniform(ks[0], (3 * hidden_dim, input_dim),
                              jnp.float32, -bound, bound)
    W_hh = jax.random.uniform(ks[1], (3 * hidden_dim, hidden_dim),
                              jnp.float32, -bound, bound)
    b_ih = jax.random.uniform(ks[2], (3 * hidden_dim,), jnp.float32, -bound, bound)
    b_hh = jax.random.uniform(ks[3], (3 * hidden_dim,), jnp.float32, -bound, bound)
    W_fc = jax.random.uniform(ks[4], (num_classes, hidden_dim),
                              jnp.float32, -bound, bound)
    b_fc = jax.random.uniform(ks[5], (num_classes,), jnp.float32, -bound, bound)
    return (W_ih, W_hh, b_ih, b_hh, W_fc, b_fc)


if __name__ == "__main__":
    # Small shapes consistent with the module (scaled down from 16/3328/1024/101).
    B, T, F, H, C = 2, 8, 256, 128, 16

    root = jax.random.PRNGKey(0)
    k_param, k_feat = jax.random.split(root)
    params = init_params(k_param, F, H, C)
    feature = jax.random.normal(k_feat, (B, T, F), dtype=jnp.float32)

    fwd = jax.jit(recurrent_classifier_forward)
    logits, last_out = jax.block_until_ready(fwd(feature, params))

    ref_logits, ref_last = reference_forward(feature, params)

    assert logits.shape == (B * T, C), logits.shape
    assert last_out.shape == (B, C), last_out.shape
    # bf16 weights/activations on the MXU (f32 accumulation) -> small drift.
    assert jnp.allclose(logits, ref_logits, rtol=2e-2, atol=3e-2), \
        float(jnp.max(jnp.abs(logits - ref_logits)))
    assert jnp.allclose(last_out, ref_last, rtol=2e-2, atol=3e-2), \
        float(jnp.max(jnp.abs(last_out - ref_last)))

    print("KERNEL_OK")
</pallas_src>

<mosaic_0001>
module attributes {stable_mosaic.version = 11 : i64} {
  func.func @_matmul_bias_kernel(%arg0: i32, %arg1: i32, %arg2: i32, %arg3: memref<64x256xbf16, #tpu.memory_space<vmem>>, %arg4: memref<256x128xbf16, #tpu.memory_space<vmem>>, %arg5: memref<1x128xf32, #tpu.memory_space<vmem>>, %arg6: memref<64x128xf32, #tpu.memory_space<vmem>>, %arg7: memref<64x128xf32, #tpu.memory_space<vmem>>) attributes {dimension_semantics = [#tpu.dimension_semantics<parallel>, #tpu.dimension_semantics<parallel>, #tpu.dimension_semantics<arbitrary>], iteration_bounds = array<i64: 1, 3, 1>, scalar_prefetch = 0 : i64, scratch_operands = 1 : i64, tpu.core_type = #tpu.core_type<tc>, window_params = [{transform_indices = @transform_0, window_bounds = array<i64: 64, 256>}, {transform_indices = @transform_1, window_bounds = array<i64: 256, 128>}, {transform_indices = @transform_2, window_bounds = array<i64: 1, 128>}, {transform_indices = @transform_3, window_bounds = array<i64: 64, 128>}]} {
    %c0_i32 = arith.constant 0 : i32
    %0 = arith.cmpi eq, %arg2, %c0_i32 : i32
    %1 = arith.extui %0 : i1 to i32
    %c0_i32_0 = arith.constant 0 : i32
    %2 = arith.cmpi ne, %1, %c0_i32_0 : i32
    scf.if %2 {
      %cst_10 = arith.constant 0.000000e+00 : f32
      %12 = vector.broadcast %cst_10 : f32 to vector<64x128xf32>
      %c0_11 = arith.constant 0 : index
      %c0_12 = arith.constant 0 : index
      %13 = vector.load %arg7[%c0_11, %c0_12] : memref<64x128xf32, #tpu.memory_space<vmem>>, vector<64x128xf32>
      tpu.vector_store %arg7[%c0_11, %c0_12], %12 {strides = array<i32>} : memref<64x128xf32, #tpu.memory_space<vmem>>, vector<64x128xf32>,
    } else {
    }
    %c0 = arith.constant 0 : index
    %c0_1 = arith.constant 0 : index
    %3 = vector.load %arg7[%c0, %c0_1] : memref<64x128xf32, #tpu.memory_space<vmem>>, vector<64x128xf32>
    %c0_2 = arith.constant 0 : index
    %c0_3 = arith.constant 0 : index
    %4 = vector.load %arg3[%c0_2, %c0_3] : memref<64x256xbf16, #tpu.memory_space<vmem>>, vector<64x256xbf16>
    %c0_4 = arith.constant 0 : index
    %c0_5 = arith.constant 0 : index
    %5 = vector.load %arg4[%c0_4, %c0_5] : memref<256x128xbf16, #tpu.memory_space<vmem>>, vector<256x128xbf16>
    %cst = arith.constant dense<0.000000e+00> : vector<64x128xf32>
    %6 = tpu.matmul %4, %5, %cst {dimension_numbers = #tpu.dot_dimension_numbers<[1], [0], [0], [1], [0, 0, 1, 1], [], []>} : vector<64x256xbf16>, vector<256x128xbf16>, vector<64x128xf32> -> vector<64x128xf32>
    %7 = arith.addf %3, %6 : vector<64x128xf32>
    %c0_6 = arith.constant 0 : index
    %c0_7 = arith.constant 0 : index
    %8 = vector.load %arg7[%c0_6, %c0_7] : memref<64x128xf32, #tpu.memory_space<vmem>>, vector<64x128xf32>
    tpu.vector_store %arg7[%c0_6, %c0_7], %7 {strides = array<i32>} : memref<64x128xf32, #tpu.memory_space<vmem>>, vector<64x128xf32>,
    %c0_i32_8 = arith.constant 0 : i32
    %9 = arith.cmpi eq, %arg2, %c0_i32_8 : i32
    %10 = arith.extui %9 : i1 to i32
    %c0_i32_9 = arith.constant 0 : i32
    %11 = arith.cmpi ne, %10, %c0_i32_9 : i32
    scf.if %11 {
      %c0_10 = arith.constant 0 : index
      %c0_11 = arith.constant 0 : index
      %12 = vector.load %arg7[%c0_10, %c0_11] : memref<64x128xf32, #tpu.memory_space<vmem>>, vector<64x128xf32>
      %c0_12 = arith.constant 0 : index
      %c0_13 = arith.constant 0 : index
      %13 = vector.load %arg5[%c0_12, %c0_13] : memref<1x128xf32, #tpu.memory_space<vmem>>, vector<1x128xf32>
      %14 = vector.broadcast %13 : vector<1x128xf32> to vector<64x128xf32>
      %15 = arith.addf %12, %14 : vector<64x128xf32>
      %c0_14 = arith.constant 0 : index
      %c0_15 = arith.constant 0 : index
      %16 = vector.load %arg6[%c0_14, %c0_15] : memref<64x128xf32, #tpu.memory_space<vmem>>, vector<64x128xf32>
      tpu.vector_store %arg6[%c0_14, %c0_15], %15 {strides = array<i32>} : memref<64x128xf32, #tpu.memory_space<vmem>>, vector<64x128xf32>,
    } else {
    }
    return
  }
  func.func @transform_0(%arg0: i32, %arg1: i32, %arg2: i32) -> (i32, i32) {
    %c0_i32 = arith.constant 0 : i32
    return %arg0, %arg2 : i32, i32
  }
  func.func @transform_1(%arg0: i32, %arg1: i32, %arg2: i32) -> (i32, i32) {
    %c0_i32 = arith.constant 0 : i32
    return %arg2, %arg1 : i32, i32
  }
  func.func @transform_2(%arg0: i32, %arg1: i32, %arg2: i32) -> (i32, i32) {
    %c0_i32 = arith.constant 0 : i32
    %c0_i32_0 = arith.constant 0 : i32
    return %c0_i32, %arg1 : i32, i32
  }
  func.func @transform_3(%arg0: i32, %arg1: i32, %arg2: i32) -> (i32, i32) {
    %c0_i32 = arith.constant 0 : i32
    return %arg0, %arg1 : i32, i32
  }
}

module attributes {stable_mosaic.version = 11 : i64} {
  func.func @_gru_recurrence_kernel(%arg0: i32, %arg1: memref<8x8x384xf32, #tpu.memory_space<vmem>>, %arg2: memref<128x384xbf16, #tpu.memory_space<vmem>>, %arg3: memref<1x384xf32, #tpu.memory_space<vmem>>, %arg4: memref<8x8x128xf32, #tpu.memory_space<vmem>>) attributes {dimension_semantics = [#tpu.dimension_semantics<parallel>], iteration_bounds = array<i64: 1>, scalar_prefetch = 0 : i64, scratch_operands = 0 : i64, tpu.core_type = #tpu.core_type<tc>, window_params = [{transform_indices = @transform_0, window_bounds = array<i64: 8, 8, 384>}, {pipeline_mode = #tpu.pipeline_mode<synchronous>, transform_indices = @transform_1, window_bounds = array<i64: 128, 384>}, {pipeline_mode = #tpu.pipeline_mode<synchronous>, transform_indices = @transform_2, window_bounds = array<i64: 1, 384>}, {transform_indices = @transform_3, window_bounds = array<i64: 8, 8, 128>}]} {
    %c0 = arith.constant 0 : index
    %c0_0 = arith.constant 0 : index
    %0 = vector.load %arg3[%c0, %c0_0] : memref<1x384xf32, #tpu.memory_space<vmem>>, vector<1x384xf32>
    %1 = vector.shape_cast %0 : vector<1x384xf32> to vector<1x384xf32>
    %2 = vector.broadcast %1 : vector<1x384xf32> to vector<8x384xf32>
    %cst = arith.constant 0.000000e+00 : f32
    %3 = vector.broadcast %cst : f32 to vector<8x128xf32>
    %c0_i32 = arith.constant 0 : i32
    %4 = arith.index_cast %c0_i32 : i32 to index
    %c0_1 = arith.constant 0 : index
    %c0_2 = arith.constant 0 : index
    %5 = vector.load %arg1[%4, %c0_1, %c0_2] : memref<8x8x384xf32, #tpu.memory_space<vmem>>, vector<1x8x384xf32>
    %6 = vector.shape_cast %5 : vector<1x8x384xf32> to vector<8x384xf32>
    %7 = arith.truncf %3 : vector<8x128xf32> to vector<8x128xbf16>
    %c0_3 = arith.constant 0 : index
    %c0_4 = arith.constant 0 : index
    %8 = vector.load %arg2[%c0_3, %c0_4] : memref<128x384xbf16, #tpu.memory_space<vmem>>, vector<128x384xbf16>
    %cst_5 = arith.constant dense<0.000000e+00> : vector<8x384xf32>
    %9 = tpu.matmul %7, %8, %cst_5 {dimension_numbers = #tpu.dot_dimension_numbers<[1], [0], [0], [1], [0, 0, 1, 1], [], []>} : vector<8x128xbf16>, vector<128x384xbf16>, vector<8x384xf32> -> vector<8x384xf32>
    %10 = arith.addf %9, %2 : vector<8x384xf32>
    %11 = vector.extract_strided_slice %6 {offsets = [0, 0], sizes = [8, 128], strides = [1, 1]} : vector<8x384xf32> to vector<8x128xf32>
    %12 = vector.extract_strided_slice %10 {offsets = [0, 0], sizes = [8, 128], strides = [1, 1]} : vector<8x384xf32> to vector<8x128xf32>
    %13 = arith.addf %11, %12 : vector<8x128xf32>
    %14 = arith.negf %13 : vector<8x128xf32>
    %15 = math.exp %14 : vector<8x128xf32>
    %cst_6 = arith.constant 1.000000e+00 : f32
    %16 = vector.broadcast %cst_6 : f32 to vector<8x128xf32>
    %17 = arith.addf %16, %15 : vector<8x128xf32>
    %18 = arith.divf %16, %17 : vector<8x128xf32>
    %19 = vector.extract_strided_slice %6 {offsets = [0, 128], sizes = [8, 128], strides = [1, 1]} : vector<8x384xf32> to vector<8x128xf32>
    %20 = vector.extract_strided_slice %10 {offsets = [0, 128], sizes = [8, 128], strides = [1, 1]} : vector<8x384xf32> to vector<8x128xf32>
    %21 = arith.addf %19, %20 : vector<8x128xf32>
    %22 = arith.negf %21 : vector<8x128xf32>
    %23 = math.exp %22 : vector<8x128xf32>
    %cst_7 = arith.constant 1.000000e+00 : f32
    %24 = vector.broadcast %cst_7 : f32 to vector<8x128xf32>
    %25 = arith.addf %24, %23 : vector<8x128xf32>
    %26 = arith.divf %24, %25 : vector<8x128xf32>
    %27 = vector.extract_strided_slice %6 {offsets = [0, 256], sizes = [8, 128], strides = [1, 1]} : vector<8x384xf32> to vector<8x128xf32>
    %28 = vector.extract_strided_slice %10 {offsets = [0, 256], sizes = [8, 128], strides = [1, 1]} : vector<8x384xf32> to vector<8x128xf32>
    %29 = arith.mulf %18, %28 : vector<8x128xf32>
    %30 = arith.addf %27, %29 : vector<8x128xf32>
    %31 = math.tanh %30 : vector<8x128xf32>
    %cst_8 = arith.constant 1.000000e+00 : f32
    %32 = vector.broadcast %cst_8 : f32 to vector<8x128xf32>
    %33 = arith.subf %32, %26 : vector<8x128xf32>
    %34 = arith.mulf %33, %31 : vector<8x128xf32>
    %35 = arith.mulf %26, %3 : vector<8x128xf32>
    %36 = arith.addf %34, %35 : vector<8x128xf32>
    %37 = arith.index_cast %c0_i32 : i32 to index
    %c0_9 = arith.constant 0 : index
    %c0_10 = arith.constant 0 : index
    %38 = vector.load %arg4[%37, %c0_9, %c0_10] : memref<8x8x128xf32, #tpu.memory_space<vmem>>, vector<1x8x128xf32>
    %39 = vector.shape_cast %38 : vector<1x8x128xf32> to vector<8x128xf32>
    %40 = vector.shape_cast %36 : vector<8x128xf32> to vector<1x8x128xf32>
    tpu.vector_store %arg4[%37, %c0_9, %c0_10], %40 {strides = array<i32>} : memref<8x8x128xf32, #tpu.memory_space<vmem>>, vector<1x8x128xf32>,
    %c1_i32 = arith.constant 1 : i32
    %41 = arith.index_cast %c1_i32 : i32 to index
    %c0_11 = arith.constant 0 : index
    %c0_12 = arith.constant 0 : index
    %42 = vector.load %arg1[%41, %c0_11, %c0_12] : memref<8x8x384xf32, #tpu.memory_space<vmem>>, vector<1x8x384xf32>
    %43 = vector.shape_cast %42 : vector<1x8x384xf32> to vector<8x384xf32>
    %44 = arith.truncf %36 : vector<8x128xf32> to vector<8x128xbf16>
    %c0_13 = arith.constant 0 : index
    %c0_14 = arith.constant 0 : index
    %45 = vector.load %arg2[%c0_13, %c0_14] : memref<128x384xbf16, #tpu.memory_space<vmem>>, vector<128x384xbf16>
    %cst_15 = arith.constant dense<0.000000e+00> : vector<8x384xf32>
    %46 = tpu.matmul %44, %45, %cst_15 {dimension_numbers = #tpu.dot_dimension_numbers<[1], [0], [0], [1], [0, 0, 1, 1], [], []>} : vector<8x128xbf16>, vector<128x384xbf16>, vector<8x384xf32> -> vector<8x384xf32>
    %47 = arith.addf %46, %2 : vector<8x384xf32>
    %48 = vector.extract_strided_slice %43 {offsets = [0, 0], sizes = [8, 128], strides = [1, 1]} : vector<8x384xf32> to vector<8x128xf32>
    %49 = vector.extract_strided_slice %47 {offsets = [0, 0], sizes = [8, 128], strides = [1, 1]} : vector<8x384xf32> to vector<8x128xf32>
    %50 = arith.addf %48, %49 : vector<8x128xf32>
    %51 = arith.negf %50 : vector<8x128xf32>
    %52 = math.exp %51 : vector<8x128xf32>
    %cst_16 = arith.constant 1.000000e+00 : f32
    %53 = vector.broadcast %cst_16 : f32 to vector<8x128xf32>
    %54 = arith.addf %53, %52 : vector<8x128xf32>
    %55 = arith.divf %53, %54 : vector<8x128xf32>
    %56 = vector.extract_strided_slice %43 {offsets = [0, 128], sizes = [8, 128], strides = [1, 1]} : vector<8x384xf32> to vector<8x128xf32>
    %57 = vector.extract_strided_slice %47 {offsets = [0, 128], sizes = [8, 128], strides = [1, 1]} : vector<8x384xf32> to vector<8x128xf32>
    %58 = arith.addf %56, %57 : vector<8x128xf32>
    %59 = arith.negf %58 : vector<8x128xf32>
    %60 = math.exp %59 : vector<8x128xf32>
    %cst_17 = arith.constant 1.000000e+00 : f32
    %61 = vector.broadcast %cst_17 : f32 to vector<8x128xf32>
    %62 = arith.addf %61, %60 : vector<8x128xf32>
    %63 = arith.divf %61, %62 : vector<8x128xf32>
    %64 = vector.extract_strided_slice %43 {offsets = [0, 256], sizes = [8, 128], strides = [1, 1]} : vector<8x384xf32> to vector<8x128xf32>
    %65 = vector.extract_strided_slice %47 {offsets = [0, 256], sizes = [8, 128], strides = [1, 1]} : vector<8x384xf32> to vector<8x128xf32>
    %66 = arith.mulf %55, %65 : vector<8x128xf32>
    %67 = arith.addf %64, %66 : vector<8x128xf32>
    %68 = math.tanh %67 : vector<8x128xf32>
    %cst_18 = arith.constant 1.000000e+00 : f32
    %69 = vector.broadcast %cst_18 : f32 to vector<8x128xf32>
    %70 = arith.subf %69, %63 : vector<8x128xf32>
    %71 = arith.mulf %70, %68 : vector<8x128xf32>
    %72 = arith.mulf %63, %36 : vector<8x128xf32>
    %73 = arith.addf %71, %72 : vector<8x128xf32>
    %74 = arith.index_cast %c1_i32 : i32 to index
    %c0_19 = arith.constant 0 : index
    %c0_20 = arith.constant 0 : index
    %75 = vector.load %arg4[%74, %c0_19, %c0_20] : memref<8x8x128xf32, #tpu.memory_space<vmem>>, vector<1x8x128xf32>
    %76 = vector.shape_cast %75 : vector<1x8x128xf32> to vector<8x128xf32>
    %77 = vector.shape_cast %73 : vector<8x128xf32> to vector<1x8x128xf32>
    tpu.vector_store %arg4[%74, %c0_19, %c0_20], %77 {strides = array<i32>} : memref<8x8x128xf32, #tpu.memory_space<vmem>>, vector<1x8x128xf32>,
    %c2_i32 = arith.constant 2 : i32
    %78 = arith.index_cast %c2_i32 : i32 to index
    %c0_21 = arith.constant 0 : index
    %c0_22 = arith.constant 0 : index
    %79 = vector.load %arg1[%78, %c0_21, %c0_22] : memref<8x8x384xf32, #tpu.memory_space<vmem>>, vector<1x8x384xf32>
    %80 = vector.shape_cast %79 : vector<1x8x384xf32> to vector<8x384xf32>
    %81 = arith.truncf %73 : vector<8x128xf32> to vector<8x128xbf16>
    %c0_23 = arith.constant 0 : index
    %c0_24 = arith.constant 0 : index
    %82 = vector.load %arg2[%c0_23, %c0_24] : memref<128x384xbf16, #tpu.memory_space<vmem>>, vector<128x384xbf16>
    %cst_25 = arith.constant dense<0.000000e+00> : vector<8x384xf32>
    %83 = tpu.matmul %81, %82, %cst_25 {dimension_numbers = #tpu.dot_dimension_numbers<[1], [0], [0], [1], [0, 0, 1, 1], [], []>} : vector<8x128xbf16>, vector<128x384xbf16>, vector<8x384xf32> -> vector<8x384xf32>
    %84 = arith.addf %83, %2 : vector<8x384xf32>
    %85 = vector.extract_strided_slice %80 {offsets = [0, 0], sizes = [8, 128], strides = [1, 1]} : vector<8x384xf32> to vector<8x128xf32>
    %86 = vector.extract_strided_slice %84 {offsets = [0, 0], sizes = [8, 128], strides = [1, 1]} : vector<8x384xf32> to vector<8x128xf32>
    %87 = arith.addf %85, %86 : vector<8x128xf32>
    %88 = arith.negf %87 : vector<8x128xf32>
    %89 = math.exp %88 : vector<8x128xf32>
    %cst_26 = arith.constant 1.000000e+00 : f32
    %90 = vector.broadcast %cst_26 : f32 to vector<8x128xf32>
    %91 = arith.addf %90, %89 : vector<8x128xf32>
    %92 = arith.divf %90, %91 : vector<8x128xf32>
    %93 = vector.extract_strided_slice %80 {offsets = [0, 128], sizes = [8, 128], strides = [1, 1]} : vector<8x384xf32> to vector<8x128xf32>
    %94 = vector.extract_strided_slice %84 {offsets = [0, 128], sizes = [8, 128], strides = [1, 1]} : vector<8x384xf32> to vector<8x128xf32>
    %95 = arith.addf %93, %94 : vector<8x128xf32>
    %96 = arith.negf %95 : vector<8x128xf32>
    %97 = math.exp %96 : vector<8x128xf32>
    %cst_27 = arith.constant 1.000000e+00 : f32
    %98 = vector.broadcast %cst_27 : f32 to vector<8x128xf32>
    %99 = arith.addf %98, %97 : vector<8x128xf32>
    %100 = arith.divf %98, %99 : vector<8x128xf32>
    %101 = vector.extract_strided_slice %80 {offsets = [0, 256], sizes = [8, 128], strides = [1, 1]} : vector<8x384xf32> to vector<8x128xf32>
    %102 = vector.extract_strided_slice %84 {offsets = [0, 256], sizes = [8, 128], strides = [1, 1]} : vector<8x384xf32> to vector<8x128xf32>
    %103 = arith.mulf %92, %102 : vector<8x128xf32>
    %104 = arith.addf %101, %103 : vector<8x128xf32>
    %105 = math.tanh %104 : vector<8x128xf32>
    %cst_28 = arith.constant 1.000000e+00 : f32
    %106 = vector.broadcast %cst_28 : f32 to vector<8x128xf32>
    %107 = arith.subf %106, %100 : vector<8x128xf32>
    %108 = arith.mulf %107, %105 : vector<8x128xf32>
    %109 = arith.mulf %100, %73 : vector<8x128xf32>
    %110 = arith.addf %108, %109 : vector<8x128xf32>
    %111 = arith.index_cast %c2_i32 : i32 to index
    %c0_29 = arith.constant 0 : index
    %c0_30 = arith.constant 0 : index
    %112 = vector.load %arg4[%111, %c0_29, %c0_30] : memref<8x8x128xf32, #tpu.memory_space<vmem>>, vector<1x8x128xf32>
    %113 = vector.shape_cast %112 : vector<1x8x128xf32> to vector<8x128xf32>
    %114 = vector.shape_cast %110 : vector<8x128xf32> to vector<1x8x128xf32>
    tpu.vector_store %arg4[%111, %c0_29, %c0_30], %114 {strides = array<i32>} : memref<8x8x128xf32, #tpu.memory_space<vmem>>, vector<1x8x128xf32>,
    %c3_i32 = arith.constant 3 : i32
    %115 = arith.index_cast %c3_i32 : i32 to index
    %c0_31 = arith.constant 0 : index
    %c0_32 = arith.constant 0 : index
    %116 = vector.load %arg1[%115, %c0_31, %c0_32] : memref<8x8x384xf32, #tpu.memory_space<vmem>>, vector<1x8x384xf32>
    %117 = vector.shape_cast %116 : vector<1x8x384xf32> to vector<8x384xf32>
    %118 = arith.truncf %110 : vector<8x128xf32> to vector<8x128xbf16>
    %c0_33 = arith.constant 0 : index
    %c0_34 = arith.constant 0 : index
    %119 = vector.load %arg2[%c0_33, %c0_34] : memref<128x384xbf16, #tpu.memory_space<vmem>>, vector<128x384xbf16>
    %cst_35 = arith.constant dense<0.000000e+00> : vector<8x384xf32>
    %120 = tpu.matmul %118, %119, %cst_35 {dimension_numbers = #tpu.dot_dimension_numbers<[1], [0], [0], [1], [0, 0, 1, 1], [], []>} : vector<8x128xbf16>, vector<128x384xbf16>, vector<8x384xf32> -> vector<8x384xf32>
    %121 = arith.addf %120, %2 : vector<8x384xf32>
    %122 = vector.extract_strided_slice %117 {offsets = [0, 0], sizes = [8, 128], strides = [1, 1]} : vector<8x384xf32> to vector<8x128xf32>
    %123 = vector.extract_strided_slice %121 {offsets = [0, 0], sizes = [8, 128], strides = [1, 1]} : vector<8x384xf32> to vector<8x128xf32>
    %124 = arith.addf %122, %123 : vector<8x128xf32>
    %125 = arith.negf %124 : vector<8x128xf32>
    %126 = math.exp %125 : vector<8x128xf32>
    %cst_36 = arith.constant 1.000000e+00 : f32
    %127 = vector.broadcast %cst_36 : f32 to vector<8x128xf32>
    %128 = arith.addf %127, %126 : vector<8x128xf32>
    %129 = arith.divf %127, %128 : vector<8x128xf32>
    %130 = vector.extract_strided_slice %117 {offsets = [0, 128], sizes = [8, 128], strides = [1, 1]} : vector<8x384xf32> to vector<8x128xf32>
    %131 = vector.extract_strided_slice %121 {offsets = [0, 128], sizes = [8, 128], strides = [1, 1]} : vector<8x384xf32> to vector<8x128xf32>
    %132 = arith.addf %130, %131 : vector<8x128xf32>
    %133 = arith.negf %132 : vector<8x128xf32>
    %134 = math.exp %133 : vector<8x128xf32>
    %cst_37 = arith.constant 1.000000e+00 : f32
    %135 = vector.broadcast %cst_37 : f32 to vector<8x128xf32>
    %136 = arith.addf %135, %134 : vector<8x128xf32>
    %137 = arith.divf %135, %136 : vector<8x128xf32>
    %138 = vector.extract_strided_slice %117 {offsets = [0, 256], sizes = [8, 128], strides = [1, 1]} : vector<8x384xf32> to vector<8x128xf32>
    %139 = vector.extract_strided_slice %121 {offsets = [0, 256], sizes = [8, 128], strides = [1, 1]} : vector<8x384xf32> to vector<8x128xf32>
    %140 = arith.mulf %129, %139 : vector<8x128xf32>
    %141 = arith.addf %138, %140 : vector<8x128xf32>
    %142 = math.tanh %141 : vector<8x128xf32>
    %cst_38 = arith.constant 1.000000e+00 : f32
    %143 = vector.broadcast %cst_38 : f32 to vector<8x128xf32>
    %144 = arith.subf %143, %137 : vector<8x128xf32>
    %145 = arith.mulf %144, %142 : vector<8x128xf32>
    %146 = arith.mulf %137, %110 : vector<8x128xf32>
    %147 = arith.addf %145, %146 : vector<8x128xf32>
    %148 = arith.index_cast %c3_i32 : i32 to index
    %c0_39 = arith.constant 0 : index
    %c0_40 = arith.constant 0 : index
    %149 = vector.load %arg4[%148, %c0_39, %c0_40] : memref<8x8x128xf32, #tpu.memory_space<vmem>>, vector<1x8x128xf32>
    %150 = vector.shape_cast %149 : vector<1x8x128xf32> to vector<8x128xf32>
    %151 = vector.shape_cast %147 : vector<8x128xf32> to vector<1x8x128xf32>
    tpu.vector_store %arg4[%148, %c0_39, %c0_40], %151 {strides = array<i32>} : memref<8x8x128xf32, #tpu.memory_space<vmem>>, vector<1x8x128xf32>,
    %c4_i32 = arith.constant 4 : i32
    %152 = arith.index_cast %c4_i32 : i32 to index
    %c0_41 = arith.constant 0 : index
    %c0_42 = arith.constant 0 : index
    %153 = vector.load %arg1[%152, %c0_41, %c0_42] : memref<8x8x384xf32, #tpu.memory_space<vmem>>, vector<1x8x384xf32>
    %154 = vector.shape_cast %153 : vector<1x8x384xf32> to vector<8x384xf32>
    %155 = arith.truncf %147 : vector<8x128xf32> to vector<8x128xbf16>
    %c0_43 = arith.constant 0 : index
    %c0_44 = arith.constant 0 : index
    %156 = vector.load %arg2[%c0_43, %c0_44] : memref<128x384xbf16, #tpu.memory_space<vmem>>, vector<128x384xbf16>
    %cst_45 = arith.constant dense<0.000000e+00> : vector<8x384xf32>
    %157 = tpu.matmul %155, %156, %cst_45 {dimension_numbers = #tpu.dot_dimension_numbers<[1], [0], [0], [1], [0, 0, 1, 1], [], []>} : vector<8x128xbf16>, vector<128x384xbf16>, vector<8x384xf32> -> vector<8x384xf32>
    %158 = arith.addf %157, %2 : vector<8x384xf32>
    %159 = vector.extract_strided_slice %154 {offsets = [0, 0], sizes = [8, 128], strides = [1, 1]} : vector<8x384xf32> to vector<8x128xf32>
    %160 = vector.extract_strided_slice %158 {offsets = [0, 0], sizes = [8, 128], strides = [1, 1]} : vector<8x384xf32> to vector<8x128xf32>
    %161 = arith.addf %159, %160 : vector<8x128xf32>
    %162 = arith.negf %161 : vector<8x128xf32>
    %163 = math.exp %162 : vector<8x128xf32>
    %cst_46 = arith.constant 1.000000e+00 : f32
    %164 = vector.broadcast %cst_46 : f32 to vector<8x128xf32>
    %165 = arith.addf %164, %163 : vector<8x128xf32>
    %166 = arith.divf %164, %165 : vector<8x128xf32>
    %167 = vector.extract_strided_slice %154 {offsets = [0, 128], sizes = [8, 128], strides = [1, 1]} : vector<8x384xf32> to vector<8x128xf32>
    %168 = vector.extract_strided_slice %158 {offsets = [0, 128], sizes = [8, 128], strides = [1, 1]} : vector<8x384xf32> to vector<8x128xf32>
    %169 = arith.addf %167, %168 : vector<8x128xf32>
    %170 = arith.negf %169 : vector<8x128xf32>
    %171 = math.exp %170 : vector<8x128xf32>
    %cst_47 = arith.constant 1.000000e+00 : f32
    %172 = vector.broadcast %cst_47 : f32 to vector<8x128xf32>
    %173 = arith.addf %172, %171 : vector<8x128xf32>
    %174 = arith.divf %172, %173 : vector<8x128xf32>
    %175 = vector.extract_strided_slice %154 {offsets = [0, 256], sizes = [8, 128], strides = [1, 1]} : vector<8x384xf32> to vector<8x128xf32>
    %176 = vector.extract_strided_slice %158 {offsets = [0, 256], sizes = [8, 128], strides = [1, 1]} : vector<8x384xf32> to vector<8x128xf32>
    %177 = arith.mulf %166, %176 : vector<8x128xf32>
    %178 = arith.addf %175, %177 : vector<8x128xf32>
    %179 = math.tanh %178 : vector<8x128xf32>
    %cst_48 = arith.constant 1.000000e+00 : f32
    %180 = vector.broadcast %cst_48 : f32 to vector<8x128xf32>
    %181 = arith.subf %180, %174 : vector<8x128xf32>
    %182 = arith.mulf %181, %179 : vector<8x128xf32>
    %183 = arith.mulf %174, %147 : vector<8x128xf32>
    %184 = arith.addf %182, %183 : vector<8x128xf32>
    %185 = arith.index_cast %c4_i32 : i32 to index
    %c0_49 = arith.constant 0 : index
    %c0_50 = arith.constant 0 : index
    %186 = vector.load %arg4[%185, %c0_49, %c0_50] : memref<8x8x128xf32, #tpu.memory_space<vmem>>, vector<1x8x128xf32>
    %187 = vector.shape_cast %186 : vector<1x8x128xf32> to vector<8x128xf32>
    %188 = vector.shape_cast %184 : vector<8x128xf32> to vector<1x8x128xf32>
    tpu.vector_store %arg4[%185, %c0_49, %c0_50], %188 {strides = array<i32>} : memref<8x8x128xf32, #tpu.memory_space<vmem>>, vector<1x8x128xf32>,
    %c5_i32 = arith.constant 5 : i32
    %189 = arith.index_cast %c5_i32 : i32 to index
    %c0_51 = arith.constant 0 : index
    %c0_52 = arith.constant 0 : index
    %190 = vector.load %arg1[%189, %c0_51, %c0_52] : memref<8x8x384xf32, #tpu.memory_space<vmem>>, vector<1x8x384xf32>
    %191 = vector.shape_cast %190 : vector<1x8x384xf32> to vector<8x384xf32>
    %192 = arith.truncf %184 : vector<8x128xf32> to vector<8x128xbf16>
    %c0_53 = arith.constant 0 : index
    %c0_54 = arith.constant 0 : index
    %193 = vector.load %arg2[%c0_53, %c0_54] : memref<128x384xbf16, #tpu.memory_space<vmem>>, vector<128x384xbf16>
    %cst_55 = arith.constant dense<0.000000e+00> : vector<8x384xf32>
    %194 = tpu.matmul %192, %193, %cst_55 {dimension_numbers = #tpu.dot_dimension_numbers<[1], [0], [0], [1], [0, 0, 1, 1], [], []>} : vector<8x128xbf16>, vector<128x384xbf16>, vector<8x384xf32> -> vector<8x384xf32>
    %195 = arith.addf %194, %2 : vector<8x384xf32>
    %196 = vector.extract_strided_slice %191 {offsets = [0, 0], sizes = [8, 128], strides = [1, 1]} : vector<8x384xf32> to vector<8x128xf32>
    %197 = vector.extract_strided_slice %195 {offsets = [0, 0], sizes = [8, 128], strides = [1, 1]} : vector<8x384xf32> to vector<8x128xf32>
    %198 = arith.addf %196, %197 : vector<8x128xf32>
    %199 = arith.negf %198 : vector<8x128xf32>
    %200 = math.exp %199 : vector<8x128xf32>
    %cst_56 = arith.constant 1.000000e+00 : f32
    %201 = vector.broadcast %cst_56 : f32 to vector<8x128xf32>
    %202 = arith.addf %201, %200 : vector<8x128xf32>
    %203 = arith.divf %201, %202 : vector<8x128xf32>
    %204 = vector.extract_strided_slice %191 {offsets = [0, 128], sizes = [8, 128], strides = [1, 1]} : vector<8x384xf32> to vector<8x128xf32>
    %205 = vector.extract_strided_slice %195 {offsets = [0, 128], sizes = [8, 128], strides = [1, 1]} : vector<8x384xf32> to vector<8x128xf32>
    %206 = arith.addf %204, %205 : vector<8x128xf32>
    %207 = arith.negf %206 : vector<8x128xf32>
    %208 = math.exp %207 : vector<8x128xf32>
    %cst_57 = arith.constant 1.000000e+00 : f32
    %209 = vector.broadcast %cst_57 : f32 to vector<8x128xf32>
    %210 = arith.addf %209, %208 : vector<8x128xf32>
    %211 = arith.divf %209, %210 : vector<8x128xf32>
    %212 = vector.extract_strided_slice %191 {offsets = [0, 256], sizes = [8, 128], strides = [1, 1]} : vector<8x384xf32> to vector<8x128xf32>
    %213 = vector.extract_strided_slice %195 {offsets = [0, 256], sizes = [8, 128], strides = [1, 1]} : vector<8x384xf32> to vector<8x128xf32>
    %214 = arith.mulf %203, %213 : vector<8x128xf32>
    %215 = arith.addf %212, %214 : vector<8x128xf32>
    %216 = math.tanh %215 : vector<8x128xf32>
    %cst_58 = arith.constant 1.000000e+00 : f32
    %217 = vector.broadcast %cst_58 : f32 to vector<8x128xf32>
    %218 = arith.subf %217, %211 : vector<8x128xf32>
    %219 = arith.mulf %218, %216 : vector<8x128xf32>
    %220 = arith.mulf %211, %184 : vector<8x128xf32>
    %221 = arith.addf %219, %220 : vector<8x128xf32>
    %222 = arith.index_cast %c5_i32 : i32 to index
    %c0_59 = arith.constant 0 : index
    %c0_60 = arith.constant 0 : index
    %223 = vector.load %arg4[%222, %c0_59, %c0_60] : memref<8x8x128xf32, #tpu.memory_space<vmem>>, vector<1x8x128xf32>
    %224 = vector.shape_cast %223 : vector<1x8x128xf32> to vector<8x128xf32>
    %225 = vector.shape_cast %221 : vector<8x128xf32> to vector<1x8x128xf32>
    tpu.vector_store %arg4[%222, %c0_59, %c0_60], %225 {strides = array<i32>} : memref<8x8x128xf32, #tpu.memory_space<vmem>>, vector<1x8x128xf32>,
    %c6_i32 = arith.constant 6 : i32
    %226 = arith.index_cast %c6_i32 : i32 to index
    %c0_61 = arith.constant 0 : index
    %c0_62 = arith.constant 0 : index
    %227 = vector.load %arg1[%226, %c0_61, %c0_62] : memref<8x8x384xf32, #tpu.memory_space<vmem>>, vector<1x8x384xf32>
    %228 = vector.shape_cast %227 : vector<1x8x384xf32> to vector<8x384xf32>
    %229 = arith.truncf %221 : vector<8x128xf32> to vector<8x128xbf16>
    %c0_63 = arith.constant 0 : index
    %c0_64 = arith.constant 0 : index
    %230 = vector.load %arg2[%c0_63, %c0_64] : memref<128x384xbf16, #tpu.memory_space<vmem>>, vector<128x384xbf16>
    %cst_65 = arith.constant dense<0.000000e+00> : vector<8x384xf32>
    %231 = tpu.matmul %229, %230, %cst_65 {dimension_numbers = #tpu.dot_dimension_numbers<[1], [0], [0], [1], [0, 0, 1, 1], [], []>} : vector<8x128xbf16>, vector<128x384xbf16>, vector<8x384xf32> -> vector<8x384xf32>
    %232 = arith.addf %231, %2 : vector<8x384xf32>
    %233 = vector.extract_strided_slice %228 {offsets = [0, 0], sizes = [8, 128], strides = [1, 1]} : vector<8x384xf32> to vector<8x128xf32>
    %234 = vector.extract_strided_slice %232 {offsets = [0, 0], sizes = [8, 128], strides = [1, 1]} : vector<8x384xf32> to vector<8x128xf32>
    %235 = arith.addf %233, %234 : vector<8x128xf32>
    %236 = arith.negf %235 : vector<8x128xf32>
    %237 = math.exp %236 : vector<8x128xf32>
    %cst_66 = arith.constant 1.000000e+00 : f32
    %238 = vector.broadcast %cst_66 : f32 to vector<8x128xf32>
    %239 = arith.addf %238, %237 : vector<8x128xf32>
    %240 = arith.divf %238, %239 : vector<8x128xf32>
    %241 = vector.extract_strided_slice %228 {offsets = [0, 128], sizes = [8, 128], strides = [1, 1]} : vector<8x384xf32> to vector<8x128xf32>
    %242 = vector.extract_strided_slice %232 {offsets = [0, 128], sizes = [8, 128], strides = [1, 1]} : vector<8x384xf32> to vector<8x128xf32>
    %243 = arith.addf %241, %242 : vector<8x128xf32>
    %244 = arith.negf %243 : vector<8x128xf32>
    %245 = math.exp %244 : vector<8x128xf32>
    %cst_67 = arith.constant 1.000000e+00 : f32
    %246 = vector.broadcast %cst_67 : f32 to vector<8x128xf32>
    %247 = arith.addf %246, %245 : vector<8x128xf32>
    %248 = arith.divf %246, %247 : vector<8x128xf32>
    %249 = vector.extract_strided_slice %228 {offsets = [0, 256], sizes = [8, 128], strides = [1, 1]} : vector<8x384xf32> to vector<8x128xf32>
    %250 = vector.extract_strided_slice %232 {offsets = [0, 256], sizes = [8, 128], strides = [1, 1]} : vector<8x384xf32> to vector<8x128xf32>
    %251 = arith.mulf %240, %250 : vector<8x128xf32>
    %252 = arith.addf %249, %251 : vector<8x128xf32>
    %253 = math.tanh %252 : vector<8x128xf32>
    %cst_68 = arith.constant 1.000000e+00 : f32
    %254 = vector.broadcast %cst_68 : f32 to vector<8x128xf32>
    %255 = arith.subf %254, %248 : vector<8x128xf32>
    %256 = arith.mulf %255, %253 : vector<8x128xf32>
    %257 = arith.mulf %248, %221 : vector<8x128xf32>
    %258 = arith.addf %256, %257 : vector<8x128xf32>
    %259 = arith.index_cast %c6_i32 : i32 to index
    %c0_69 = arith.constant 0 : index
    %c0_70 = arith.constant 0 : index
    %260 = vector.load %arg4[%259, %c0_69, %c0_70] : memref<8x8x128xf32, #tpu.memory_space<vmem>>, vector<1x8x128xf32>
    %261 = vector.shape_cast %260 : vector<1x8x128xf32> to vector<8x128xf32>
    %262 = vector.shape_cast %258 : vector<8x128xf32> to vector<1x8x128xf32>
    tpu.vector_store %arg4[%259, %c0_69, %c0_70], %262 {strides = array<i32>} : memref<8x8x128xf32, #tpu.memory_space<vmem>>, vector<1x8x128xf32>,
    %c7_i32 = arith.constant 7 : i32
    %263 = arith.index_cast %c7_i32 : i32 to index
    %c0_71 = arith.constant 0 : index
    %c0_72 = arith.constant 0 : index
    %264 = vector.load %arg1[%263, %c0_71, %c0_72] : memref<8x8x384xf32, #tpu.memory_space<vmem>>, vector<1x8x384xf32>
    %265 = vector.shape_cast %264 : vector<1x8x384xf32> to vector<8x384xf32>
    %266 = arith.truncf %258 : vector<8x128xf32> to vector<8x128xbf16>
    %c0_73 = arith.constant 0 : index
    %c0_74 = arith.constant 0 : index
    %267 = vector.load %arg2[%c0_73, %c0_74] : memref<128x384xbf16, #tpu.memory_space<vmem>>, vector<128x384xbf16>
    %cst_75 = arith.constant dense<0.000000e+00> : vector<8x384xf32>
    %268 = tpu.matmul %266, %267, %cst_75 {dimension_numbers = #tpu.dot_dimension_numbers<[1], [0], [0], [1], [0, 0, 1, 1], [], []>} : vector<8x128xbf16>, vector<128x384xbf16>, vector<8x384xf32> -> vector<8x384xf32>
    %269 = arith.addf %268, %2 : vector<8x384xf32>
    %270 = vector.extract_strided_slice %265 {offsets = [0, 0], sizes = [8, 128], strides = [1, 1]} : vector<8x384xf32> to vector<8x128xf32>
    %271 = vector.extract_strided_slice %269 {offsets = [0, 0], sizes = [8, 128], strides = [1, 1]} : vector<8x384xf32> to vector<8x128xf32>
    %272 = arith.addf %270, %271 : vector<8x128xf32>
    %273 = arith.negf %272 : vector<8x128xf32>
    %274 = math.exp %273 : vector<8x128xf32>
    %cst_76 = arith.constant 1.000000e+00 : f32
    %275 = vector.broadcast %cst_76 : f32 to vector<8x128xf32>
    %276 = arith.addf %275, %274 : vector<8x128xf32>
    %277 = arith.divf %275, %276 : vector<8x128xf32>
    %278 = vector.extract_strided_slice %265 {offsets = [0, 128], sizes = [8, 128], strides = [1, 1]} : vector<8x384xf32> to vector<8x128xf32>
    %279 = vector.extract_strided_slice %269 {offsets = [0, 128], sizes = [8, 128], strides = [1, 1]} : vector<8x384xf32> to vector<8x128xf32>
    %280 = arith.addf %278, %279 : vector<8x128xf32>
    %281 = arith.negf %280 : vector<8x128xf32>
    %282 = math.exp %281 : vector<8x128xf32>
    %cst_77 = arith.constant 1.000000e+00 : f32
    %283 = vector.broadcast %cst_77 : f32 to vector<8x128xf32>
    %284 = arith.addf %283, %282 : vector<8x128xf32>
    %285 = arith.divf %283, %284 : vector<8x128xf32>
    %286 = vector.extract_strided_slice %265 {offsets = [0, 256], sizes = [8, 128], strides = [1, 1]} : vector<8x384xf32> to vector<8x128xf32>
    %287 = vector.extract_strided_slice %269 {offsets = [0, 256], sizes = [8, 128], strides = [1, 1]} : vector<8x384xf32> to vector<8x128xf32>
    %288 = arith.mulf %277, %287 : vector<8x128xf32>
    %289 = arith.addf %286, %288 : vector<8x128xf32>
    %290 = math.tanh %289 : vector<8x128xf32>
    %cst_78 = arith.constant 1.000000e+00 : f32
    %291 = vector.broadcast %cst_78 : f32 to vector<8x128xf32>
    %292 = arith.subf %291, %285 : vector<8x128xf32>
    %293 = arith.mulf %292, %290 : vector<8x128xf32>
    %294 = arith.mulf %285, %258 : vector<8x128xf32>
    %295 = arith.addf %293, %294 : vector<8x128xf32>
    %296 = arith.index_cast %c7_i32 : i32 to index
    %c0_79 = arith.constant 0 : index
    %c0_80 = arith.constant 0 : index
    %297 = vector.load %arg4[%296, %c0_79, %c0_80] : memref<8x8x128xf32, #tpu.memory_space<vmem>>, vector<1x8x128xf32>
    %298 = vector.shape_cast %297 : vector<1x8x128xf32> to vector<8x128xf32>
    %299 = vector.shape_cast %295 : vector<8x128xf32> to vector<1x8x128xf32>
    tpu.vector_store %arg4[%296, %c0_79, %c0_80], %299 {strides = array<i32>} : memref<8x8x128xf32, #tpu.memory_space<vmem>>, vector<1x8x128xf32>,
    %c8_i32 = arith.constant 8 : i32
    return
  }
  func.func @transform_0(%arg0: i32) -> (i32, i32, i32) {
    %c0_i32 = arith.constant 0 : i32
    %c0_i32_0 = arith.constant 0 : i32
    %c0_i32_1 = arith.constant 0 : i32
    return %c0_i32, %arg0, %c0_i32_0 : i32, i32, i32
  }
  func.func @transform_1(%arg0: i32) -> (i32, i32) {
    %c0_i32 = arith.constant 0 : i32
    %c0_i32_0 = arith.constant 0 : i32
    %c0_i32_1 = arith.constant 0 : i32
    return %c0_i32, %c0_i32_0 : i32, i32
  }
  func.func @transform_2(%arg0: i32) -> (i32, i32) {
    %c0_i32 = arith.constant 0 : i32
    %c0_i32_0 = arith.constant 0 : i32
    %c0_i32_1 = arith.constant 0 : i32
    return %c0_i32, %c0_i32_0 : i32, i32
  }
  func.func @transform_3(%arg0: i32) -> (i32, i32, i32) {
    %c0_i32 = arith.constant 0 : i32
    %c0_i32_0 = arith.constant 0 : i32
    %c0_i32_1 = arith.constant 0 : i32
    return %c0_i32, %arg0, %c0_i32_0 : i32, i32, i32
  }
}

module attributes {stable_mosaic.version = 11 : i64} {
  func.func @_matmul_bias_kernel(%arg0: i32, %arg1: i32, %arg2: i32, %arg3: memref<64x128xbf16, #tpu.memory_space<vmem>>, %arg4: memref<128x128xbf16, #tpu.memory_space<vmem>>, %arg5: memref<1x128xf32, #tpu.memory_space<vmem>>, %arg6: memref<64x128xf32, #tpu.memory_space<vmem>>, %arg7: memref<64x128xf32, #tpu.memory_space<vmem>>) attributes {dimension_semantics = [#tpu.dimension_semantics<parallel>, #tpu.dimension_semantics<parallel>, #tpu.dimension_semantics<arbitrary>], iteration_bounds = array<i64: 1, 1, 1>, scalar_prefetch = 0 : i64, scratch_operands = 1 : i64, tpu.core_type = #tpu.core_type<tc>, window_params = [{transform_indices = @transform_0, window_bounds = array<i64: 64, 128>}, {transform_indices = @transform_1, window_bounds = array<i64: 128, 128>}, {transform_indices = @transform_2, window_bounds = array<i64: 1, 128>}, {transform_indices = @transform_3, window_bounds = array<i64: 64, 128>}]} {
    %c0_i32 = arith.constant 0 : i32
    %0 = arith.cmpi eq, %arg2, %c0_i32 : i32
    %1 = arith.extui %0 : i1 to i32
    %c0_i32_0 = arith.constant 0 : i32
    %2 = arith.cmpi ne, %1, %c0_i32_0 : i32
    scf.if %2 {
      %cst_10 = arith.constant 0.000000e+00 : f32
      %12 = vector.broadcast %cst_10 : f32 to vector<64x128xf32>
      %c0_11 = arith.constant 0 : index
      %c0_12 = arith.constant 0 : index
      %13 = vector.load %arg7[%c0_11, %c0_12] : memref<64x128xf32, #tpu.memory_space<vmem>>, vector<64x128xf32>
      tpu.vector_store %arg7[%c0_11, %c0_12], %12 {strides = array<i32>} : memref<64x128xf32, #tpu.memory_space<vmem>>, vector<64x128xf32>,
    } else {
    }
    %c0 = arith.constant 0 : index
    %c0_1 = arith.constant 0 : index
    %3 = vector.load %arg7[%c0, %c0_1] : memref<64x128xf32, #tpu.memory_space<vmem>>, vector<64x128xf32>
    %c0_2 = arith.constant 0 : index
    %c0_3 = arith.constant 0 : index
    %4 = vector.load %arg3[%c0_2, %c0_3] : memref<64x128xbf16, #tpu.memory_space<vmem>>, vector<64x128xbf16>
    %c0_4 = arith.constant 0 : index
    %c0_5 = arith.constant 0 : index
    %5 = vector.load %arg4[%c0_4, %c0_5] : memref<128x128xbf16, #tpu.memory_space<vmem>>, vector<128x128xbf16>
    %cst = arith.constant dense<0.000000e+00> : vector<64x128xf32>
    %6 = tpu.matmul %4, %5, %cst {dimension_numbers = #tpu.dot_dimension_numbers<[1], [0], [0], [1], [0, 0, 1, 1], [], []>} : vector<64x128xbf16>, vector<128x128xbf16>, vector<64x128xf32> -> vector<64x128xf32>
    %7 = arith.addf %3, %6 : vector<64x128xf32>
    %c0_6 = arith.constant 0 : index
    %c0_7 = arith.constant 0 : index
    %8 = vector.load %arg7[%c0_6, %c0_7] : memref<64x128xf32, #tpu.memory_space<vmem>>, vector<64x128xf32>
    tpu.vector_store %arg7[%c0_6, %c0_7], %7 {strides = array<i32>} : memref<64x128xf32, #tpu.memory_space<vmem>>, vector<64x128xf32>,
    %c0_i32_8 = arith.constant 0 : i32
    %9 = arith.cmpi eq, %arg2, %c0_i32_8 : i32
    %10 = arith.extui %9 : i1 to i32
    %c0_i32_9 = arith.constant 0 : i32
    %11 = arith.cmpi ne, %10, %c0_i32_9 : i32
    scf.if %11 {
      %c0_10 = arith.constant 0 : index
      %c0_11 = arith.constant 0 : index
      %12 = vector.load %arg7[%c0_10, %c0_11] : memref<64x128xf32, #tpu.memory_space<vmem>>, vector<64x128xf32>
      %c0_12 = arith.constant 0 : index
      %c0_13 = arith.constant 0 : index
      %13 = vector.load %arg5[%c0_12, %c0_13] : memref<1x128xf32, #tpu.memory_space<vmem>>, vector<1x128xf32>
      %14 = vector.broadcast %13 : vector<1x128xf32> to vector<64x128xf32>
      %15 = arith.addf %12, %14 : vector<64x128xf32>
      %c0_14 = arith.constant 0 : index
      %c0_15 = arith.constant 0 : index
      %16 = vector.load %arg6[%c0_14, %c0_15] : memref<64x128xf32, #tpu.memory_space<vmem>>, vector<64x128xf32>
      tpu.vector_store %arg6[%c0_14, %c0_15], %15 {strides = array<i32>} : memref<64x128xf32, #tpu.memory_space<vmem>>, vector<64x128xf32>,
    } else {
    }
    return
  }
  func.func @transform_0(%arg0: i32, %arg1: i32, %arg2: i32) -> (i32, i32) {
    %c0_i32 = arith.constant 0 : i32
    return %arg0, %arg2 : i32, i32
  }
  func.func @transform_1(%arg0: i32, %arg1: i32, %arg2: i32) -> (i32, i32) {
    %c0_i32 = arith.constant 0 : i32
    return %arg2, %arg1 : i32, i32
  }
  func.func @transform_2(%arg0: i32, %arg1: i32, %arg2: i32) -> (i32, i32) {
    %c0_i32 = arith.constant 0 : i32
    %c0_i32_0 = arith.constant 0 : i32
    return %c0_i32, %arg1 : i32, i32
  }
  func.func @transform_3(%arg0: i32, %arg1: i32, %arg2: i32) -> (i32, i32) {
    %c0_i32 = arith.constant 0 : i32
    return %arg0, %arg1 : i32, i32
  }
}

</mosaic_0001>

<bundles_post_ra>
// kernel: recurrent_classifier_forward.3
= control target key start
LH: loop header
LB: loop body
LE: loop exit
PB: predicated region body
PF: predicated region fallthrough
CT: control target
= control target key end

     0   :  { %s1125_s12 = smov 0   ;;  %s1127_s13 = smov 0   ;;  %s1334_s0 = inlined_call_operand.vmem [shape: bf16[64,256], index: 0, kind: input, shape index: {}]   ;;  %s1335_s1 = inlined_call_operand.vmem [shape: bf16[256,384], index: 1, kind: input, shape index: {}]   ;;  %s1336_s2 = inlined_call_operand.vmem [shape: f32[1,384], index: 2, kind: input, shape index: {}]   ;;  %s1337_s3 = inlined_call_operand.vmem [shape: f32[64,384], index: 3, kind: output, shape index: {}]  }
   0x1   :  { %s1129_s14 = smov 0   ;;  %s1131_s15 = smov 0  }
   0x2   :  { %s1133_s16 = smov 0  }
   0x3 LB: > { %s28_s17 = sadd.s32 1, %s1099_s15  ;;  %s902_s18 = sadd.s32 4294967295, %s1103_s16   ;;  %s1103_s16 = sphi %s1133_s16, %s13_s16   ;;  %s1099_s15 = sphi %s1131_s15, %s1342_s15   ;;  %s1095_s14 = sphi %s1129_s14, %s1341_s14   ;;  %s1091_s13 = sphi %s1127_s13, %s1340_s13   ;;  %s1087_s12 = sphi %s1125_s12, %s1339_s12  }
   0x4   : > { %p30_p0 = scmp.ge.s32.totalorder %s28_s17, 3  ;;  %p76_p1 = scmp.ne.s32.totalorder %s1091_s13, %s1087_s12 }
   0x5   : > { %p77_p2 = scmp.eq.s32.totalorder %s1103_s16, 0  ;;  %p134_p4 = scmp.eq.s32.totalorder %s902_s18, 2 }
   0x6   : > { %s1344_s17 = smov (%p30_p0, %s28_s17), 0  ;;  %s69_s20 = sadd.s32 1, %s1091_s13 }
   0x7   : > { %p78_p3 = por %p77_p2, %p76_p1  ;;  %s65_s19 = ssub.s32 %s1099_s15, %s1344_s17 }
   0x8   : > { %p67_p5 = scmp.eq.s32.totalorder %s65_s19, 0  ;;  %p1160_p6 = por %p134_p4, %p76_p1 }
   0x9   : > { %p906_p7 = scmp.ge.s32.totalorder %s1103_s16, 3 }
   0xa   : > { %s1165_s22 = scalar_select %p67_p5, %s1091_s13, %s69_s20  }
   0xb   : > { %171 = sbr.rel (%p906_p7) target bundleno = 41 (0x29), region = 20 }
  0x10   : > { %174 = sbr.rel (!%p78_p3) target bundleno = 41 (0x29), region = 24  ;;  %s176_s23 = sand.u32 (%p78_p3), 1, %s1091_s13  }
  0x11   : > { %s908_s24 = sshll.u32 (%p78_p3), %s1099_s15, 2  ;;  %s907_s25 = sshll.u32 (%p78_p3), %s176_s23, 7 }
  0x12   : > { %s1173_s28 = scalar_lea.vmem (%p78_p3), %s1335_s1, %s908_s24  ;;  %s1177_s29 = scalar_lea.vmem (%p78_p3), [#allocation3], %s907_s25 }
  0x13   : > { %v200_v0 = vld [vmem:[%s1173_s28] sm:$0xf] (%p78_p3)  ;;  %v202_v1 = vld [vmem:[%s1173_s28 + $0xc] sm:$0xf] (%p78_p3)  ;;  %v204_v2 = vld [vmem:[%s1173_s28 + $0x18] sm:$0xf] (%p78_p3) }
  0x14   : > { %201 = vst [vmem:[%s1177_s29] sm:$0xf] (%p78_p3), %v200_v0  ;;  %203 = vst [vmem:[%s1177_s29 + $0x4] sm:$0xf] (%p78_p3), %v202_v1  ;;  %v206_v3 = vld [vmem:[%s1173_s28 + $0x24] sm:$0xf] (%p78_p3) }
  0x15   : > { %v208_v4 = vld [vmem:[%s1173_s28 + $0x30] sm:$0xf]  ;;  %205 = vst [vmem:[%s1177_s29 + $0x8] sm:$0xf] %v204_v2  ;;  %207 = vst [vmem:[%s1177_s29 + $0xc] sm:$0xf] %v206_v3 }
  0x16   : > { %209 = vst [vmem:[%s1177_s29 + $0x10] sm:$0xf] %v208_v4  ;;  %v210_v5 = vld [vmem:[%s1173_s28 + $0x3c] sm:$0xf]  ;;  %v212_v6 = vld [vmem:[%s1173_s28 + $0x48] sm:$0xf] }
  0x17   : > { %v214_v7 = vld [vmem:[%s1173_s28 + $0x54] sm:$0xf]  ;;  %211 = vst [vmem:[%s1177_s29 + $0x14] sm:$0xf] %v210_v5  ;;  %213 = vst [vmem:[%s1177_s29 + $0x18] sm:$0xf] %v212_v6 }
  0x18   : > { %215 = vst [vmem:[%s1177_s29 + $0x1c] sm:$0xf] %v214_v7  ;;  %v216_v8 = vld [vmem:[%s1173_s28 + $0x60] sm:$0xf]  ;;  %v218_v9 = vld [vmem:[%s1173_s28 + $0x6c] sm:$0xf] }
  0x19   : > { %v220_v10 = vld [vmem:[%s1173_s28 + $0x78] sm:$0xf]  ;;  %217 = vst [vmem:[%s1177_s29 + $0x20] sm:$0xf] %v216_v8  ;;  %219 = vst [vmem:[%s1177_s29 + $0x24] sm:$0xf] %v218_v9 }
  0x1a   : > { %221 = vst [vmem:[%s1177_s29 + $0x28] sm:$0xf] %v220_v10  ;;  %v222_v11 = vld [vmem:[%s1173_s28 + $0x84] sm:$0xf]  ;;  %v224_v12 = vld [vmem:[%s1173_s28 + $0x90] sm:$0xf] }
  0x1b   : > { %v226_v13 = vld [vmem:[%s1173_s28 + $0x9c] sm:$0xf]  ;;  %223 = vst [vmem:[%s1177_s29 + $0x2c] sm:$0xf] %v222_v11  ;;  %225 = vst [vmem:[%s1177_s29 + $0x30] sm:$0xf] %v224_v12 }
  0x1c   : > { %227 = vst [vmem:[%s1177_s29 + $0x34] sm:$0xf] %v226_v13  ;;  %v228_v14 = vld [vmem:[%s1173_s28 + $0xa8] sm:$0xf]  ;;  %v230_v15 = vld [vmem:[%s1173_s28 + $0xb4] sm:$0xf] }
  0x1d   : > { %v232_v16 = vld [vmem:[%s1173_s28 + $0xc0] sm:$0xf]  ;;  %229 = vst [vmem:[%s1177_s29 + $0x38] sm:$0xf] %v228_v14  ;;  %231 = vst [vmem:[%s1177_s29 + $0x3c] sm:$0xf] %v230_v15 }
  0x1e   : > { %233 = vst [vmem:[%s1177_s29 + $0x40] sm:$0xf] %v232_v16  ;;  %v234_v17 = vld [vmem:[%s1173_s28 + $0xcc] sm:$0xf]  ;;  %v236_v18 = vld [vmem:[%s1173_s28 + $0xd8] sm:$0xf] }
  0x1f   : > { %v238_v19 = vld [vmem:[%s1173_s28 + $0xe4] sm:$0xf]  ;;  %235 = vst [vmem:[%s1177_s29 + $0x44] sm:$0xf] %v234_v17  ;;  %237 = vst [vmem:[%s1177_s29 + $0x48] sm:$0xf] %v236_v18 }
  0x20   : > { %239 = vst [vmem:[%s1177_s29 + $0x4c] sm:$0xf] %v238_v19  ;;  %v240_v20 = vld [vmem:[%s1173_s28 + $0xf0] sm:$0xf]  ;;  %v242_v21 = vld [vmem:[%s1173_s28 + $0xfc] sm:$0xf] }
  0x21   : > { %v244_v22 = vld [vmem:[%s1173_s28 + $0x108] sm:$0xf]  ;;  %241 = vst [vmem:[%s1177_s29 + $0x50] sm:$0xf] %v240_v20  ;;  %243 = vst [vmem:[%s1177_s29 + $0x54] sm:$0xf] %v242_v21 }
  0x22   : > { %245 = vst [vmem:[%s1177_s29 + $0x58] sm:$0xf] %v244_v22  ;;  %v246_v23 = vld [vmem:[%s1173_s28 + $0x114] sm:$0xf]  ;;  %v248_v24 = vld [vmem:[%s1173_s28 + $0x120] sm:$0xf] }
  0x23   : > { %v250_v25 = vld [vmem:[%s1173_s28 + $0x12c] sm:$0xf]  ;;  %247 = vst [vmem:[%s1177_s29 + $0x5c] sm:$0xf] %v246_v23  ;;  %249 = vst [vmem:[%s1177_s29 + $0x60] sm:$0xf] %v248_v24 }
  0x24   : > { %251 = vst [vmem:[%s1177_s29 + $0x64] sm:$0xf] %v250_v25  ;;  %v252_v26 = vld [vmem:[%s1173_s28 + $0x138] sm:$0xf]  ;;  %v254_v27 = vld [vmem:[%s1173_s28 + $0x144] sm:$0xf] }
  0x25   : > { %v256_v28 = vld [vmem:[%s1173_s28 + $0x150] sm:$0xf]  ;;  %253 = vst [vmem:[%s1177_s29 + $0x68] sm:$0xf] %v252_v26  ;;  %255 = vst [vmem:[%s1177_s29 + $0x6c] sm:$0xf] %v254_v27 }
  0x26   : > { %257 = vst [vmem:[%s1177_s29 + $0x70] sm:$0xf] %v256_v28  ;;  %v258_v29 = vld [vmem:[%s1173_s28 + $0x15c] sm:$0xf]  ;;  %v260_v30 = vld [vmem:[%s1173_s28 + $0x168] sm:$0xf] }
  0x27   : > { %v262_v31 = vld [vmem:[%s1173_s28 + $0x174] sm:$0xf]  ;;  %259 = vst [vmem:[%s1177_s29 + $0x74] sm:$0xf] %v258_v29  ;;  %261 = vst [vmem:[%s1177_s29 + $0x78] sm:$0xf] %v260_v30 }
  0x28   : > { %263 = vst [vmem:[%s1177_s29 + $0x7c] sm:$0xf] %v262_v31 }
  0x29 PF: > { %p909_p8 = scmp.ge.s32.totalorder %s1103_s16, 1  ;;  %p356_p9 = scmp.lt.s32.totalorder %s1103_s16, 4 }
  0x2b   : > { %p357_p10 = pnand %p909_p8, %p356_p9 }
  0x2c   : > { %s363_s30 = sand.u32 (!%p357_p10), 1, %s1087_s12   ;;  %p411_p11 = scmp.lt.s32.totalorder (!%p357_p10), %s1095_s14, 2 }
  0x2d   : > { %360 = sbr.rel (%p357_p10) target bundleno = 305 (0x131), region = 69  ;;  %s910_s4 = sshll.u32 (!%p357_p10), %s363_s30, 7 }
  0x2e   : > { %s1252_s9 = scalar_lea.vmem (!%p357_p10), [#allocation3], %s910_s4  ;;  %s911_s8 = sshll.u32 (!%p357_p10), %s363_s30, 6 }
  0x32   : > { %v1055_v32 = vld [vmem:[%s1334_s0 + $0x4] ss:$8 sps:$4 sm:$0xff]   ;;  %v1037_v34 = vld [vmem:[%s1252_s9 + $0x78] sm:$0xff]   ;;  %v1039_v36 = vld [vmem:[%s1252_s9 + $0x70] sm:$0xff]   ;;  %s412_s4 = scalar_select %p411_p11, %s1095_s14, 2 }
  0x33   : > { %v1058_v33 = vld [vmem:[%s1334_s0 + $0x24] ss:$8 sps:$4 sm:$0xff]   ;;  %644 = vmatprep.mubr.bf16.mxu0 %v1055_v32  ;;  %v1038_v35 = vld [vmem:[%s1252_s9 + $0x38] sm:$0xff]   ;;  %941 = vmatprep.subr.bf16.mxu0 %v1037_v34  ;;  %v1040_v37 = vld [vmem:[%s1252_s9 + $0x30] sm:$0xff]   ;;  %s938_s12 = sshll.u32 (%p1160_p6), %s1095_s14, 3 }
  0x34   : > { %660 = vmatprep.mubr.bf16.mxu1 %v1058_v33  ;;  %981 = vmatprep.subr.bf16.mxu1 %v1037_v34  ;;  %v1041_v38 = vld [vmem:[%s1252_s9 + $0x68] sm:$0xff]   ;;  %v1043_v40 = vld [vmem:[%s1252_s9 + $0x60] sm:$0xff]   ;;  %v1045_v42 = vld [vmem:[%s1252_s9 + $0x58] sm:$0xff]   ;;  %s413_s7 = scalar_lea.vmem %s1336_s2, %s412_s4  ;;  %s738_s11 = scalar_lea.vmem (%p1160_p6), %s1337_s3, %s938_s12 }
  0x35   : > { %942 = vmatpush3.bf16.msra.mxu0 %v1038_v35  ;;  %989 = vmatpush3.bf16.msra.mxu1 %v1038_v35  ;;  %v1042_v39 = vld [vmem:[%s1252_s9 + $0x28] sm:$0xff]   ;;  %v1044_v41 = vld [vmem:[%s1252_s9 + $0x20] sm:$0xff]   ;;  %v1046_v43 = vld [vmem:[%s1252_s9 + $0x18] sm:$0xff]  }
  0x36   : > { %943 = vmatprep.subr.bf16.mxu0 %v1039_v36  ;;  %982 = vmatprep.subr.bf16.mxu1 %v1039_v36  ;;  %v1047_v44 = vld [vmem:[%s1252_s9 + $0x50] sm:$0xff]   ;;  %v1049_v46 = vld [vmem:[%s1252_s9 + $0x48] sm:$0xff]   ;;  %v1051_v48 = vld [vmem:[%s1252_s9 + $0x40] sm:$0xff]  }
  0x37   : > { %v1048_v45 = vld [vmem:[%s1252_s9 + $0x10] sm:$0xff]   ;;  %v1050_v47 = vld [vmem:[%s1252_s9 + $0x8] sm:$0xff]   ;;  %v1052_v49 = vld [vmem:[%s1252_s9] sm:$0xff]   ;;  %s1295_s9 = scalar_lea.vmem [#allocation4], %s911_s8 }
  0x38   : > { %v1053_v50 = vld [vmem:[%s1334_s0] ss:$8 sps:$4 sm:$0xff]   ;;  %v1059_v52 = vld [vmem:[%s1334_s0 + $0x14] ss:$8 sps:$4 sm:$0xff]   ;;  %v1063_v54 = vld [vmem:[%s1334_s0 + $0x10] ss:$8 sps:$4 sm:$0xff]  }
  0x39   : > { %944 = vmatpush3.bf16.msra.mxu0 %v1040_v37  ;;  %990 = vmatpush3.bf16.msra.mxu1 %v1040_v37  ;;  %v1056_v51 = vld [vmem:[%s1334_s0 + $0x20] ss:$8 sps:$4 sm:$0xff]   ;;  %v1061_v53 = vld [vmem:[%s1334_s0 + $0x34] ss:$8 sps:$4 sm:$0xff]   ;;  %v1064_v55 = vld [vmem:[%s1334_s0 + $0x30] ss:$8 sps:$4 sm:$0xff]  }
  0x3a   : > { %945 = vmatprep.subr.bf16.mxu0 %v1041_v38  ;;  %983 = vmatprep.subr.bf16.mxu1 %v1041_v38  ;;  %v936_v59 = vld [vmem:[%s413_s7] ss:$0 sm:$0xff] }
  0x3d   : > { %946 = vmatpush3.bf16.msra.mxu0 %v1042_v39  ;;  %991 = vmatpush3.bf16.msra.mxu1 %v1042_v39 }
  0x3e   : > { %947 = vmatprep.subr.bf16.mxu0 %v1043_v40  ;;  %984 = vmatprep.subr.bf16.mxu1 %v1043_v40 }
  0x41   : > { %948 = vmatpush3.bf16.msra.mxu0 %v1044_v41  ;;  %992 = vmatpush3.bf16.msra.mxu1 %v1044_v41 }
  0x42   : > { %949 = vmatprep.subr.bf16.mxu0 %v1045_v42  ;;  %985 = vmatprep.subr.bf16.mxu1 %v1045_v42 }
  0x45   : > { %950 = vmatpush3.bf16.msra.mxu0 %v1046_v43  ;;  %993 = vmatpush3.bf16.msra.mxu1 %v1046_v43 }
  0x46   : > { %951 = vmatprep.subr.bf16.mxu0 %v1047_v44  ;;  %986 = vmatprep.subr.bf16.mxu1 %v1047_v44 }
  0x49   : > { %952 = vmatpush3.bf16.msra.mxu0 %v1048_v45  ;;  %994 = vmatpush3.bf16.msra.mxu1 %v1048_v45 }
  0x4a   : > { %953 = vmatprep.subr.bf16.mxu0 %v1049_v46  ;;  %987 = vmatprep.subr.bf16.mxu1 %v1049_v46 }
  0x4d   : > { %954 = vmatpush3.bf16.msra.mxu0 %v1050_v47  ;;  %995 = vmatpush3.bf16.msra.mxu1 %v1050_v47 }
  0x4e   : > { %955 = vmatprep.subr.bf16.mxu0 %v1051_v48  ;;  %988 = vmatprep.subr.bf16.mxu1 %v1051_v48 }
  0x51   : > { %956 = vmatpush3.bf16.msra.mxu0 %v1052_v49  ;;  %996 = vmatpush3.bf16.msra.mxu1 %v1052_v49 }
  0x54   : > { %645 = vmatmul.mubr.bf16.vlgmr.msra.gmra.mxu0 %v1053_v50  ;;  %661 = vmatmul.mubr.bf16.vlgmr.msra.gmra.mxu1 %v1056_v51 }
  0x55   : > { %652 = vmatprep.mubr.bf16.mxu0 %v1059_v52  ;;  %668 = vmatprep.mubr.bf16.mxu1 %v1061_v53 }
  0x5c   : > { %653 = vmatmul.mubr.bf16.gmra.mxu0 %v1063_v54  ;;  %669 = vmatmul.mubr.bf16.gmra.mxu1 %v1064_v55 }
 0x114   : > { %v957_v56 = vpop.f32.mrf.mxu0  ;;  %v969_v57 = vpop.f32.mrf.mxu1 }
 0x116   : > { %v958_v58 = vpop.f32.mrf.mxu0  ;;  %v970_v60 = vpop.f32.mrf.mxu1 }
 0x117   : > { %v959_v61 = vadd.f32 %v958_v58, %v957_v56  ;;  %v971_v62 = vadd.f32 %v970_v60, %v969_v57 }
 0x118   : > { %v960_v63 = vpop.f32.mrf.mxu0  ;;  %v972_v0 = vpop.f32.mrf.mxu1 }
 0x119   : > { %v711_v1 = vadd.f32 %v959_v61, %v936_v59  ;;  %v715_v2 = vadd.f32 %v971_v62, %v936_v59 }
 0x11a   : > { %v961_v3 = vpop.f32.mrf.mxu0  ;;  %v973_v4 = vpop.f32.mrf.mxu1 }
 0x11b   : > { %719 = vst [vmem:[%s1295_s9] sm:$0xff] %v711_v1  ;;  %723 = vst [vmem:[%s1295_s9 + $0x20] sm:$0xff] %v715_v2  ;;  %v962_v5 = vadd.f32 %v961_v3, %v960_v63  ;;  %v974_v6 = vadd.f32 %v973_v4, %v972_v0 }
 0x11c   : > { %v963_v7 = vpop.f32.mrf.mxu0  ;;  %v975_v8 = vpop.f32.mrf.mxu1 }
 0x11d   : > { %v712_v9 = vadd.f32 %v962_v5, %v936_v59  ;;  %v716_v10 = vadd.f32 %v974_v6, %v936_v59 }
 0x11e   : > { %v964_v11 = vpop.f32.mrf.mxu0  ;;  %v976_v12 = vpop.f32.mrf.mxu1 }
 0x11f   : > { %720 = vst [vmem:[%s1295_s9 + $0x8] sm:$0xff] %v712_v9  ;;  %724 = vst [vmem:[%s1295_s9 + $0x28] sm:$0xff] %v716_v10  ;;  %v965_v13 = vadd.f32 %v964_v11, %v963_v7  ;;  %v977_v14 = vadd.f32 %v976_v12, %v975_v8 }
 0x120   : > { %v966_v15 = vpop.f32.mrf.mxu0  ;;  %v978_v16 = vpop.f32.mrf.mxu1 }
 0x121   : > { %v713_v17 = vadd.f32 %v965_v13, %v936_v59  ;;  %v717_v18 = vadd.f32 %v977_v14, %v936_v59 }
 0x122   : > { %v967_v19 = vpop.f32.mrf.mxu0  ;;  %v979_v20 = vpop.f32.mrf.mxu1  ;;  %v781_v25 = vld [vmem:[%s1295_s9] sm:$0xff] (%p1160_p6) }
 0x123   : > { %721 = vst [vmem:[%s1295_s9 + $0x10] sm:$0xff] %v713_v17  ;;  %725 = vst [vmem:[%s1295_s9 + $0x30] sm:$0xff] %v717_v18  ;;  %v968_v21 = vadd.f32 %v967_v19, %v966_v15  ;;  %v980_v22 = vadd.f32 %v979_v20, %v978_v16  ;;  %733 = sbr.rel (!%p1160_p6) target bundleno = 305 (0x131), region = 85  ;;  %v789_v29 = vld [vmem:[%s1295_s9 + $0x20] sm:$0xff] (%p1160_p6) }
 0x124   : > { %782 = vst [vmem:[%s738_s11] sm:$0xff] (%p1160_p6), %v781_v25  ;;  %790 = vst [vmem:[%s738_s11 + $0x60] sm:$0xff] (%p1160_p6), %v789_v29 }
 0x125   : > { %v714_v23 = vadd.f32 %v968_v21, %v936_v59  ;;  %v718_v24 = vadd.f32 %v980_v22, %v936_v59 }
 0x126   : > { %v783_v26 = vld [vmem:[%s1295_s9 + $0x8] sm:$0xff] (%p1160_p6) }
 0x127   : > { %722 = vst [vmem:[%s1295_s9 + $0x18] sm:$0xff] %v714_v23  ;;  %726 = vst [vmem:[%s1295_s9 + $0x38] sm:$0xff] %v718_v24  ;;  %v791_v30 = vld [vmem:[%s1295_s9 + $0x28] sm:$0xff] (%p1160_p6) }
 0x128   : > { %784 = vst [vmem:[%s738_s11 + $0x18] sm:$0xff] %v783_v26  ;;  %792 = vst [vmem:[%s738_s11 + $0x78] sm:$0xff] %v791_v30 }
 0x12a   : > { %v785_v27 = vld [vmem:[%s1295_s9 + $0x10] sm:$0xff] }
 0x12b   : > { %786 = vst [vmem:[%s738_s11 + $0x30] sm:$0xff] %v785_v27  ;;  %v793_v31 = vld [vmem:[%s1295_s9 + $0x30] sm:$0xff] }
 0x12c   : > { %794 = vst [vmem:[%s738_s11 + $0x90] sm:$0xff] %v793_v31 }
 0x12e   : > { %v787_v28 = vld [vmem:[%s1295_s9 + $0x18] sm:$0xff] }
 0x12f   : > { %788 = vst [vmem:[%s738_s11 + $0x48] sm:$0xff] %v787_v28  ;;  %v795_v32 = vld [vmem:[%s1295_s9 + $0x38] sm:$0xff] }
 0x130   : > { %796 = vst [vmem:[%s738_s11 + $0xa8] sm:$0xff] %v795_v32 }
 0x131 PF: > { %s13_s16 = sadd.s32 1, %s1103_s16   ;;  %s1339_s12 = smov %s1091_s13 }
 0x132   : > { %p10_p12 = scmp.ge.s32.totalorder %s13_s16, 5   ;;  %s1340_s13 = smov %s1165_s22 }
 0x133   : > { %s1341_s14 = smov %s1099_s15  ;;  %s1342_s15 = smov %s1344_s17 }
 0x134   :  { %12 = sbr.rel (!%p10_p12) target bundleno = 3 (0x3), region = 160 }

// kernel: recurrent_classifier_forward.5
= control target key start
LH: loop header
LB: loop body
LE: loop exit
PB: predicated region body
PF: predicated region fallthrough
CT: control target
= control target key end

     0   :  { %s410_s1 = inlined_call_operand.vmem [shape: bf16[128,128], index: 1, kind: input, shape index: {}]   ;;  %s411_s0 = inlined_call_operand.vmem [shape: bf16[64,128], index: 0, kind: input, shape index: {}]   ;;  %s412_s2 = inlined_call_operand.vmem [shape: f32[1,128], index: 2, kind: input, shape index: {}]   ;;  %s413_s3 = inlined_call_operand.vmem [shape: f32[64,128], index: 3, kind: output, shape index: {}]  }
   0x1   :  { %v315_v0 = vld [vmem:[%s410_s1 + $0x38] sm:$0xff]   ;;  %v316_v1 = vld [vmem:[%s410_s1 + $0x30] sm:$0xff]   ;;  %v317_v2 = vld [vmem:[%s410_s1 + $0x28] sm:$0xff]  }
   0x2   :  { %275 = vmatprep.subr.bf16.mxu0 %v315_v0  ;;  %299 = vmatprep.subr.bf16.mxu1 %v315_v0  ;;  %v318_v3 = vld [vmem:[%s410_s1 + $0x20] sm:$0xff]   ;;  %v324_v5 = vld [vmem:[%s411_s0 + $0x10] sm:$0xff]   ;;  %v319_v6 = vld [vmem:[%s410_s1 + $0x18] sm:$0xff]  }
   0x3   :  { %276 = vmatpush3.bf16.msra.mxu0 %v315_v0  ;;  %307 = vmatpush3.bf16.msra.mxu1 %v315_v0  ;;  %v323_v4 = vld [vmem:[%s411_s0] sm:$0xff]   ;;  %v320_v7 = vld [vmem:[%s410_s1 + $0x10] sm:$0xff]   ;;  %v321_v8 = vld [vmem:[%s410_s1 + $0x8] sm:$0xff]  }
   0x4   :  { %277 = vmatprep.subr.bf16.mxu0 %v316_v1  ;;  %300 = vmatprep.subr.bf16.mxu1 %v316_v1  ;;  %v322_v9 = vld [vmem:[%s410_s1] sm:$0xff]   ;;  %v325_v10 = vld [vmem:[%s411_s0 + $0x8] sm:$0xff]   ;;  %v326_v11 = vld [vmem:[%s411_s0 + $0x18] sm:$0xff]  }
   0x5   :  { %291 = vmatprep.mubr.bf16.mxu0 %v323_v4  ;;  %295 = vmatprep.mubr.bf16.mxu1 %v324_v5  ;;  %v262_v12 = vld [vmem:[%s412_s2] ss:$0 sm:$0xff] }
   0x7   :  { %278 = vmatpush3.bf16.msra.mxu0 %v316_v1  ;;  %308 = vmatpush3.bf16.msra.mxu1 %v316_v1 }
   0x8   :  { %279 = vmatprep.subr.bf16.mxu0 %v317_v2  ;;  %301 = vmatprep.subr.bf16.mxu1 %v317_v2 }
   0xb   :  { %280 = vmatpush3.bf16.msra.mxu0 %v317_v2  ;;  %309 = vmatpush3.bf16.msra.mxu1 %v317_v2 }
   0xc   :  { %281 = vmatprep.subr.bf16.mxu0 %v318_v3  ;;  %302 = vmatprep.subr.bf16.mxu1 %v318_v3 }
   0xf   :  { %282 = vmatpush3.bf16.msra.mxu0 %v318_v3  ;;  %310 = vmatpush3.bf16.msra.mxu1 %v318_v3 }
  0x10   :  { %283 = vmatprep.subr.bf16.mxu0 %v319_v6  ;;  %303 = vmatprep.subr.bf16.mxu1 %v319_v6 }
  0x13   :  { %284 = vmatpush3.bf16.msra.mxu0 %v319_v6  ;;  %311 = vmatpush3.bf16.msra.mxu1 %v319_v6 }
  0x14   :  { %285 = vmatprep.subr.bf16.mxu0 %v320_v7  ;;  %304 = vmatprep.subr.bf16.mxu1 %v320_v7 }
  0x17   :  { %286 = vmatpush3.bf16.msra.mxu0 %v320_v7  ;;  %312 = vmatpush3.bf16.msra.mxu1 %v320_v7 }
  0x18   :  { %287 = vmatprep.subr.bf16.mxu0 %v321_v8  ;;  %305 = vmatprep.subr.bf16.mxu1 %v321_v8 }
  0x1b   :  { %288 = vmatpush3.bf16.msra.mxu0 %v321_v8  ;;  %313 = vmatpush3.bf16.msra.mxu1 %v321_v8 }
  0x1c   :  { %289 = vmatprep.subr.bf16.mxu0 %v322_v9  ;;  %306 = vmatprep.subr.bf16.mxu1 %v322_v9 }
  0x1f   :  { %290 = vmatpush3.bf16.msra.mxu0 %v322_v9  ;;  %314 = vmatpush3.bf16.msra.mxu1 %v322_v9 }
  0x22   :  { %292 = vmatmul.mubr.bf16.vlgmr.msra.gmra.mxu0 %v325_v10  ;;  %296 = vmatmul.mubr.bf16.vlgmr.msra.gmra.mxu1 %v326_v11 }
  0xe2   :  { %v293_v13 = vpop.f32.mrf.mxu0  ;;  %v297_v14 = vpop.f32.mrf.mxu1 }
  0xe3   :  { %v232_v15 = vadd.f32 %v293_v13, %v262_v12  ;;  %v236_v16 = vadd.f32 %v297_v14, %v262_v12 }
  0xe4   :  { %v165_v17 = vpop.f32.mrf.mxu0  ;;  %v181_v18 = vpop.f32.mrf.mxu1 }
  0xe5   :  { %240 = vst [vmem:[%s413_s3 + $0x10] sm:$0xff] %v232_v15  ;;  %244 = vst [vmem:[%s413_s3 + $0x30] sm:$0xff] %v236_v16  ;;  %v230_v19 = vadd.f32 %v262_v12, %v165_v17  ;;  %v234_v20 = vadd.f32 %v262_v12, %v181_v18 }
  0xe6   :  { %v294_v21 = vpop.f32.mrf.mxu0  ;;  %v298_v22 = vpop.f32.mrf.mxu1 }
  0xe7   :  { %238 = vst [vmem:[%s413_s3] sm:$0xff] %v230_v19  ;;  %242 = vst [vmem:[%s413_s3 + $0x20] sm:$0xff] %v234_v20  ;;  %v233_v23 = vadd.f32 %v294_v21, %v262_v12  ;;  %v237_v24 = vadd.f32 %v298_v22, %v262_v12 }
  0xe8   :  { %v168_v25 = vpop.f32.mrf.mxu0  ;;  %v184_v26 = vpop.f32.mrf.mxu1 }
  0xe9   :  { %241 = vst [vmem:[%s413_s3 + $0x18] sm:$0xff] %v233_v23  ;;  %245 = vst [vmem:[%s413_s3 + $0x38] sm:$0xff] %v237_v24  ;;  %v231_v27 = vadd.f32 %v262_v12, %v168_v25  ;;  %v235_v28 = vadd.f32 %v262_v12, %v184_v26 }
  0xeb   :  { %239 = vst [vmem:[%s413_s3 + $0x8] sm:$0xff] %v231_v27  ;;  %243 = vst [vmem:[%s413_s3 + $0x28] sm:$0xff] %v235_v28 }

// kernel: recurrent_classifier_forward.4
= control target key start
LH: loop header
LB: loop body
LE: loop exit
PB: predicated region body
PF: predicated region fallthrough
CT: control target
= control target key end

     0   :  { %v2848_v1 = vmov 0.0   ;;  %v2849_v2 = vmov 0   ;;  %vm2850_vm0 = vmmov 0   ;;  %v17_v34 = vlaneseq  ;;  %s3606_s1 = inlined_call_operand.vmem [shape: bf16[128,384], index: 1, kind: input, shape index: {}]   ;;  %s3607_s2 = inlined_call_operand.vmem [shape: f32[1,384], index: 2, kind: input, shape index: {}]   ;;  %s3608_s0 = inlined_call_operand.vmem [shape: f32[8,8,384], index: 0, kind: input, shape index: {}]   ;;  %s3609_s3 = inlined_call_operand.vmem [shape: f32[8,8,128], index: 3, kind: output, shape index: {}]  }
   0x1   :  { %v2874_v0 = vld [vmem:[%s3606_s1 + $0xac] ss:$12 sps:$4 sm:$0xff]   ;;  %2493 = vmatprep.subr.bf16.mxu1 %v2848_v1  ;;  %227 = vmatprep.mubr.bf16.mxu0 %v2849_v2  ;;  %v2881_v3 = vld [vmem:[%s3606_s1 + $0xa8] ss:$12 sps:$4 sm:$0xff]   ;;  %v2895_v5 = vld [vmem:[%s3606_s1 + $0x90] ss:$12 sps:$4 sm:$0xff]  }
   0x2   :  { %2509 = vmatprep.mubr.msk.bf16.mxu1 %vm2850_vm0, %v2848_v1  ;;  %195 = vmatprep.subr.bf16.mxu0 %v2874_v0  ;;  %v2889_v4 = vld [vmem:[%s3606_s1 + $0x94] ss:$12 sps:$4 sm:$0xff]   ;;  %v2901_v6 = vld [vmem:[%s3606_s1 + $0x7c] ss:$12 sps:$4 sm:$0xff]   ;;  %v2907_v7 = vld [vmem:[%s3606_s1 + $0x78] ss:$12 sps:$4 sm:$0xff]  }
   0x3   :  { %196 = vmatpush1.bf16.msra.mxu0 %v2881_v3  ;;  %v2913_v8 = vld [vmem:[%s3606_s1 + $0x64] ss:$12 sps:$4 sm:$0xff]   ;;  %v2918_v9 = vld [vmem:[%s3606_s1 + $0x60] ss:$12 sps:$4 sm:$0xff]   ;;  %v2938_v13 = vld [vmem:[%s3606_s1 + $0x48] ss:$12 sps:$4 sm:$0xff]  }
   0x4   :  { %197 = vmatprep.subr.bf16.mxu0 %v2889_v4  ;;  %v2680_v10 = vld [vmem:[%s3606_s1 + $0xb0] ss:$12 sps:$4 sm:$0xff]   ;;  %v2928_v11 = vld [vmem:[%s3606_s1 + $0x4c] ss:$12 sps:$4 sm:$0xff]   ;;  %v2944_v14 = vld [vmem:[%s3606_s1 + $0x34] ss:$12 sps:$4 sm:$0xff]  }
   0x5   :  { %2494 = vmatpush3.bf16.msra.mxu1 %v2680_v10  ;;  %v2681_v12 = vld [vmem:[%s3606_s1 + $0x98] ss:$12 sps:$4 sm:$0xff]   ;;  %v2682_v15 = vld [vmem:[%s3606_s1 + $0x80] ss:$12 sps:$4 sm:$0xff]   ;;  %v2952_v16 = vld [vmem:[%s3606_s1 + $0x30] ss:$12 sps:$4 sm:$0xff]  }
   0x6   :  { %2495 = vmatprep.subr.bf16.mxu1 %v2848_v1  ;;  %v2957_v17 = vld [vmem:[%s3606_s1 + $0x1c] ss:$12 sps:$4 sm:$0xff]   ;;  %v2968_v19 = vld [vmem:[%s3606_s1 + $0x18] ss:$12 sps:$4 sm:$0xff]   ;;  %v2984_v22 = vld [vmem:[%s3606_s1] ss:$12 sps:$4 sm:$0xff]  }
   0x7   :  { %198 = vmatpush1.bf16.msra.mxu0 %v2895_v5  ;;  %v2683_v18 = vld [vmem:[%s3606_s1 + $0x68] ss:$12 sps:$4 sm:$0xff]   ;;  %v2973_v20 = vld [vmem:[%s3606_s1 + $0x4] ss:$12 sps:$4 sm:$0xff]   ;;  %v2686_v24 = vld [vmem:[%s3606_s1 + $0x20] ss:$12 sps:$4 sm:$0xff]  }
   0x8   :  { %199 = vmatprep.subr.bf16.mxu0 %v2901_v6  ;;  %v2684_v21 = vld [vmem:[%s3606_s1 + $0x50] ss:$12 sps:$4 sm:$0xff]   ;;  %v2685_v23 = vld [vmem:[%s3606_s1 + $0x38] ss:$12 sps:$4 sm:$0xff]   ;;  %v2687_v25 = vld [vmem:[%s3606_s1 + $0x8] ss:$12 sps:$4 sm:$0xff]  }
   0x9   :  { %2496 = vmatpush3.bf16.msra.mxu1 %v2681_v12  ;;  %v2688_v26 = vld [vmem:[%s3606_s1 + $0xb0] ss:$12 sps:$4 sm:$0xff]   ;;  %v2689_v27 = vld [vmem:[%s3606_s1 + $0x98] ss:$12 sps:$4 sm:$0xff]   ;;  %v2690_v28 = vld [vmem:[%s3606_s1 + $0x80] ss:$12 sps:$4 sm:$0xff]  }
   0xa   :  { %2497 = vmatprep.subr.bf16.mxu1 %v2848_v1  ;;  %v2691_v29 = vld [vmem:[%s3606_s1 + $0x68] ss:$12 sps:$4 sm:$0xff]   ;;  %v2692_v30 = vld [vmem:[%s3606_s1 + $0x50] ss:$12 sps:$4 sm:$0xff]   ;;  %v2693_v31 = vld [vmem:[%s3606_s1 + $0x38] ss:$12 sps:$4 sm:$0xff]  }
   0xb   :  { %200 = vmatpush1.bf16.msra.mxu0 %v2907_v7  ;;  %v2694_v32 = vld [vmem:[%s3606_s1 + $0x20] ss:$12 sps:$4 sm:$0xff]   ;;  %v2695_v33 = vld [vmem:[%s3606_s1 + $0x8] ss:$12 sps:$4 sm:$0xff]   ;;  %v18_v35 = vshrl.u32 %v17_v34, 7 }
   0xc   :  { %201 = vmatprep.subr.bf16.mxu0 %v2913_v8  ;;  %v15_v37 = vld [vmem:[%s3607_s2] sm:$0x7]  ;;  %v33_v49 = vld [vmem:[%s3608_s0 + $0x8] sm:$0xff]  ;;  %v34_v12 = vld [vmem:[%s3608_s0 + $0x10] sm:$0xff] }
   0xd   :  { %2498 = vmatpush3.bf16.msra.mxu1 %v2682_v15  ;;  %v19_v36 = vsub.s32 0, %v18_v35  ;;  %v23_v39 = vsub.s32 1, %v18_v35  ;;  %v32_v40 = vld [vmem:[%s3608_s0] sm:$0xff]  ;;  %v27_v59 = vsub.s32 2, %v18_v35 }
   0xe   :  { %2499 = vmatprep.subr.bf16.mxu1 %v2848_v1  ;;  %v2701_v34 = vld [vmem:[%s3606_s1 + $0x38] ss:$12 sps:$4 sm:$0xff]   ;;  %v2702_v35 = vld [vmem:[%s3606_s1 + $0x20] ss:$12 sps:$4 sm:$0xff]  }
   0xf   :  { %202 = vmatpush1.bf16.msra.mxu0 %v2918_v9  ;;  %v3060_v38 = vrot.slane %v15_v37, %v19_v36  ;;  %v3066_v43 = vrot.slane %v15_v37, %v23_v39  ;;  %v3072_v60 = vrot.slane %v15_v37, %v27_v59  ;;  %v2703_v36 = vld [vmem:[%s3606_s1 + $0x8] ss:$12 sps:$4 sm:$0xff]   ;;  %v2211_v37 = vld [vmem:[%s3608_s0 + $0x18] sm:$0xff] }
  0x10   :  { %203 = vmatprep.subr.bf16.mxu0 %v2928_v11 }
  0x11   :  { %2500 = vmatpush3.bf16.msra.mxu1 %v2683_v18 }
  0x12   :  { %2501 = vmatprep.subr.bf16.mxu1 %v2848_v1 }
  0x13   :  { %204 = vmatpush1.bf16.msra.mxu0 %v2938_v13 }
  0x14   :  { %205 = vmatprep.subr.bf16.mxu0 %v2944_v14 }
  0x15   :  { %2502 = vmatpush3.bf16.msra.mxu1 %v2684_v21 }
  0x16   :  { %2503 = vmatprep.subr.bf16.mxu1 %v2848_v1 }
  0x17   :  { %206 = vmatpush1.bf16.msra.mxu0 %v2952_v16 }
  0x18   :  { %207 = vmatprep.subr.bf16.mxu0 %v2957_v17 }
  0x19   :  { %2504 = vmatpush3.bf16.msra.mxu1 %v2685_v23 }
  0x1a   :  { %2505 = vmatprep.subr.bf16.mxu1 %v2848_v1 }
  0x1b   :  { %208 = vmatpush1.bf16.msra.mxu0 %v2968_v19 }
  0x1c   :  { %209 = vmatprep.subr.bf16.mxu0 %v2973_v20 }
  0x1d   :  { %2506 = vmatpush3.bf16.msra.mxu1 %v2686_v24 }
  0x1e   :  { %2507 = vmatprep.subr.bf16.mxu1 %v2848_v1 }
  0x1f   :  { %210 = vmatpush1.bf16.msra.mxu0 %v2984_v22 }
  0x20   :  { %463 = vmatprep.subr.bf16.mxu0 %v2874_v0 }
  0x21   :  { %2508 = vmatpush3.bf16.msra.mxu1 %v2687_v25 }
  0x22   :  { %228 = vmatmul.mubr.bf16.vlgmr.msra.gmra.mxu0 %v2849_v2  ;;  %2513 = vmatprep.subr.bf16.mxu1 %v2848_v1 }
  0x23   :  { %464 = vmatpush1.bf16.msra.mxu0 %v2881_v3  ;;  %495 = vmatprep.mubr.bf16.mxu0 %v2849_v2 }
  0x24   :  { %465 = vmatprep.subr.bf16.mxu0 %v2889_v4  ;;  %2510 = vmatmul.mubr.bf16.vlgmr.msra.gmra.mxu1 %v2849_v2 }
  0x25   :  { %2529 = vmatprep.mubr.msk.bf16.mxu1 %vm2850_vm0, %v2848_v1  ;;  %2514 = vmatpush3.bf16.msra.mxu1 %v2688_v26 }
  0x26   :  { %2515 = vmatprep.subr.bf16.mxu1 %v2848_v1 }
  0x27   :  { %466 = vmatpush1.bf16.msra.mxu0 %v2895_v5 }
  0x28   :  { %467 = vmatprep.subr.bf16.mxu0 %v2901_v6 }
  0x29   :  { %2516 = vmatpush3.bf16.msra.mxu1 %v2689_v27 }
  0x2a   :  { %2517 = vmatprep.subr.bf16.mxu1 %v2848_v1 }
  0x2b   :  { %468 = vmatpush1.bf16.msra.mxu0 %v2907_v7 }
  0x2c   :  { %469 = vmatprep.subr.bf16.mxu0 %v2913_v8 }
  0x2d   :  { %2518 = vmatpush3.bf16.msra.mxu1 %v2690_v28 }
  0x2e   :  { %2519 = vmatprep.subr.bf16.mxu1 %v2848_v1 }
  0x2f   :  { %470 = vmatpush1.bf16.msra.mxu0 %v2918_v9 }
  0x30   :  { %471 = vmatprep.subr.bf16.mxu0 %v2928_v11 }
  0x31   :  { %2520 = vmatpush3.bf16.msra.mxu1 %v2691_v29  ;;  %v2696_v29 = vld [vmem:[%s3606_s1 + $0xb0] ss:$12 sps:$4 sm:$0xff]  }
  0x32   :  { %2521 = vmatprep.subr.bf16.mxu1 %v2848_v1 }
  0x33   :  { %472 = vmatpush1.bf16.msra.mxu0 %v2938_v13 }
  0x34   :  { %473 = vmatprep.subr.bf16.mxu0 %v2944_v14 }
  0x35   :  { %2522 = vmatpush3.bf16.msra.mxu1 %v2692_v30  ;;  %v2697_v30 = vld [vmem:[%s3606_s1 + $0x98] ss:$12 sps:$4 sm:$0xff]  }
  0x36   :  { %2523 = vmatprep.subr.bf16.mxu1 %v2848_v1 }
  0x37   :  { %474 = vmatpush1.bf16.msra.mxu0 %v2952_v16 }
  0x38   :  { %475 = vmatprep.subr.bf16.mxu0 %v2957_v17 }
  0x39   :  { %2524 = vmatpush3.bf16.msra.mxu1 %v2693_v31  ;;  %v2698_v31 = vld [vmem:[%s3606_s1 + $0x80] ss:$12 sps:$4 sm:$0xff]  }
  0x3a   :  { %2525 = vmatprep.subr.bf16.mxu1 %v2848_v1 }
  0x3b   :  { %476 = vmatpush1.bf16.msra.mxu0 %v2968_v19 }
  0x3c   :  { %477 = vmatprep.subr.bf16.mxu0 %v2973_v20 }
  0x3d   :  { %2526 = vmatpush3.bf16.msra.mxu1 %v2694_v32  ;;  %v2699_v32 = vld [vmem:[%s3606_s1 + $0x68] ss:$12 sps:$4 sm:$0xff]  }
  0x3e   :  { %2527 = vmatprep.subr.bf16.mxu1 %v2848_v1 }
  0x3f   :  { %478 = vmatpush1.bf16.msra.mxu0 %v2984_v22 }
  0x40   :  { %732 = vmatprep.subr.bf16.mxu0 %v2874_v0 }
  0x41   :  { %2528 = vmatpush3.bf16.msra.mxu1 %v2695_v33  ;;  %v2700_v33 = vld [vmem:[%s3606_s1 + $0x50] ss:$12 sps:$4 sm:$0xff]  }
  0x42   :  { %2533 = vmatprep.subr.bf16.mxu1 %v2848_v1 }
  0xe2   :  { %v229_v41 = vpop.f32.mrf.mxu0 }
  0xe3   :  { %v230_v42 = vadd.f32 %v229_v41, %v3060_v38 }
  0xe4   :  { %v231_v44 = vpop.f32.mrf.mxu0  ;;  %v270_v52 = vpop.f32.mrf.mxu1 }
  0xe5   :  { %v276_v45 = vadd.f32 %v230_v42, %v32_v40  ;;  %v232_v48 = vadd.f32 %v231_v44, %v3066_v43  ;;  %v271_v63 = vadd.f32 %v270_v52, %v3072_v60 }
  0xe6   :  { %v233_v46 = vpop.f32.mrf.mxu0  ;;  %v2511_v53 = vpop.f32.mrf.mxu1 }
  0xe7   :  { %v2209_v47 = vmul.f32 -1.442695, %v276_v45  ;;  %v283_v51 = vadd.f32 %v232_v48, %v33_v49 }
  0xe8   :  { %v234_v50 = vpop.f32.mrf.mxu0  ;;  %v273_v55 = vpop.f32.mrf.mxu1 }
  0xe9   :  { %2768 = vpow2.f32 %v2209_v47  ;;  %v2210_v54 = vmul.f32 -1.442695, %v283_v51  ;;  %v2212_v50 = vld [vmem:[%s3608_s0 + $0x20] sm:$0xff] }
  0xea   :  { %v2512_v56 = vpop.f32.mrf.mxu1 }
  0xeb   :  { %2770 = vpow2.f32 %v2210_v54 }
  0xf6   :  { %v2769_v57 = vpop.eup %2768 }
  0xf7   :  { %v280_v58 = vadd.f32 1.0, %v2769_v57 }
  0xf8   :  { %v2771_v61 = vpop.eup %2770 }
  0xf9   :  { %2772 = vrcp.f32 %v280_v58  ;;  %v287_v62 = vadd.f32 1.0, %v2771_v61 }
  0xfb   :  { %2774 = vrcp.f32 %v287_v62  ;;  %v2213_v62 = vld [vmem:[%s3608_s0 + $0x28] sm:$0xff] }
 0x106   :  { %v2773_v10 = vpop.eup %2772 }
 0x107   :  { %v290_v15 = vmul.f32 %v2773_v10, %v271_v63 }
 0x108   :  { %v2775_v21 = vpop.eup %2774 }
 0x109   :  { %v291_v18 = vadd.f32 %v290_v15, %v34_v12  ;;  %v293_v23 = vsub.f32 1.0, %v2775_v21  ;;  %v295_v26 = vmul.f32 0.0, %v2775_v21 }
 0x10b   :  { %2776 = vtanh.f32 %v291_v18 }
 0x118   :  { %v2777_v24 = vpop.eup %2776 }
 0x119   :  { %v294_v25 = vmul.f32 %v2777_v24, %v293_v23 }
 0x11b   :  { %v3078_v27 = vadd.f32 %v295_v26, %v294_v25 }
 0x11d   :  { %297 = vst [vmem:[%s3609_s3] sm:$0xff] %v3078_v27  ;;  %v302_v28 = vpack.c.bf16 %v3078_v27, %v3078_v27 }
 0x11f   :  { %496 = vmatmul.mubr.bf16.vlgmr.msra.gmra.mxu0 %v302_v28  ;;  %2530 = vmatmul.mubr.bf16.vlgmr.msra.gmra.mxu1 %v302_v28 }
 0x120   :  { %733 = vmatpush1.bf16.msra.mxu0 %v2881_v3  ;;  %764 = vmatprep.mubr.bf16.mxu0 %v2849_v2 }
 0x121   :  { %734 = vmatprep.subr.bf16.mxu0 %v2889_v4  ;;  %2549 = vmatprep.mubr.msk.bf16.mxu1 %vm2850_vm0, %v2848_v1 }
 0x122   :  { %2534 = vmatpush3.bf16.msra.mxu1 %v2696_v29 }
 0x123   :  { %2535 = vmatprep.subr.bf16.mxu1 %v2848_v1 }
 0x124   :  { %735 = vmatpush1.bf16.msra.mxu0 %v2895_v5 }
 0x125   :  { %736 = vmatprep.subr.bf16.mxu0 %v2901_v6 }
 0x126   :  { %2536 = vmatpush3.bf16.msra.mxu1 %v2697_v30  ;;  %v2242_v30 = vld [vmem:[%s3608_s0 + $0x38] sm:$0xff] }
 0x127   :  { %2537 = vmatprep.subr.bf16.mxu1 %v2848_v1 }
 0x128   :  { %737 = vmatpush1.bf16.msra.mxu0 %v2907_v7 }
 0x129   :  { %738 = vmatprep.subr.bf16.mxu0 %v2913_v8 }
 0x12a   :  { %2538 = vmatpush3.bf16.msra.mxu1 %v2698_v31 }
 0x12b   :  { %2539 = vmatprep.subr.bf16.mxu1 %v2848_v1 }
 0x12c   :  { %739 = vmatpush1.bf16.msra.mxu0 %v2918_v9 }
 0x12d   :  { %740 = vmatprep.subr.bf16.mxu0 %v2928_v11 }
 0x12e   :  { %2540 = vmatpush3.bf16.msra.mxu1 %v2699_v32 }
 0x12f   :  { %2541 = vmatprep.subr.bf16.mxu1 %v2848_v1 }
 0x130   :  { %741 = vmatpush1.bf16.msra.mxu0 %v2938_v13 }
 0x131   :  { %742 = vmatprep.subr.bf16.mxu0 %v2944_v14 }
 0x132   :  { %2542 = vmatpush3.bf16.msra.mxu1 %v2700_v33 }
 0x133   :  { %2543 = vmatprep.subr.bf16.mxu1 %v2848_v1 }
 0x134   :  { %743 = vmatpush1.bf16.msra.mxu0 %v2952_v16 }
 0x135   :  { %744 = vmatprep.subr.bf16.mxu0 %v2957_v17 }
 0x136   :  { %2544 = vmatpush3.bf16.msra.mxu1 %v2701_v34 }
 0x137   :  { %2545 = vmatprep.subr.bf16.mxu1 %v2848_v1 }
 0x138   :  { %745 = vmatpush1.bf16.msra.mxu0 %v2968_v19 }
 0x139   :  { %746 = vmatprep.subr.bf16.mxu0 %v2973_v20 }
 0x13a   :  { %2546 = vmatpush3.bf16.msra.mxu1 %v2702_v35 }
 0x13b   :  { %2547 = vmatprep.subr.bf16.mxu1 %v2848_v1 }
 0x13c   :  { %747 = vmatpush1.bf16.msra.mxu0 %v2984_v22 }
 0x13d   :  { %1001 = vmatprep.subr.bf16.mxu0 %v2874_v0 }
 0x13e   :  { %2548 = vmatpush3.bf16.msra.mxu1 %v2703_v36 }
 0x13f   :  { %2553 = vmatprep.subr.bf16.mxu1 %v2848_v1 }
 0x1df   :  { %v497_v39 = vpop.f32.mrf.mxu0  ;;  %v538_v40 = vpop.f32.mrf.mxu1 }
 0x1e0   :  { %v498_v41 = vadd.f32 %v497_v39, %v3060_v38  ;;  %v539_v59 = vadd.f32 %v538_v40, %v3072_v60 }
 0x1e1   :  { %v499_v42 = vpop.f32.mrf.mxu0  ;;  %v2531_v44 = vpop.f32.mrf.mxu1 }
 0x1e2   :  { %v544_v45 = vadd.f32 %v2211_v37, %v498_v41  ;;  %v500_v49 = vadd.f32 %v499_v42, %v3066_v43  ;;  %v2243_v42 = vld [vmem:[%s3608_s0 + $0x40] sm:$0xff] }
 0x1e3   :  { %v501_v46 = vpop.f32.mrf.mxu0  ;;  %v541_v47 = vpop.f32.mrf.mxu1 }
 0x1e4   :  { %v2238_v48 = vmul.f32 -1.442695, %v544_v45  ;;  %v551_v53 = vadd.f32 %v2212_v50, %v500_v49 }
 0x1e5   :  { %v502_v51 = vpop.f32.mrf.mxu0  ;;  %v2532_v52 = vpop.f32.mrf.mxu1 }
 0x1e6   :  { %2778 = vpow2.f32 %v2238_v48  ;;  %v2239_v54 = vmul.f32 -1.442695, %v551_v53  ;;  %v2712_v53 = vld [vmem:[%s3606_s1 + $0xb0] ss:$12 sps:$4 sm:$0xff]  }
 0x1e8   :  { %2780 = vpow2.f32 %v2239_v54  ;;  %v3240_v54 = vld [vmem:[%s3606_s1 + $0x94] ss:$12 sps:$4 sm:$0xff]  }
 0x1f3   :  { %v2779_v55 = vpop.eup %2778 }
 0x1f4   :  { %v548_v56 = vadd.f32 1.0, %v2779_v55  ;;  %v2716_v55 = vld [vmem:[%s3606_s1 + $0x98] ss:$12 sps:$4 sm:$0xff]  }
 0x1f5   :  { %v2781_v57 = vpop.eup %2780 }
 0x1f6   :  { %2782 = vrcp.f32 %v548_v56  ;;  %v555_v58 = vadd.f32 1.0, %v2781_v57  ;;  %v3256_v56 = vld [vmem:[%s3606_s1 + $0x7c] ss:$12 sps:$4 sm:$0xff]   ;;  %v3262_v57 = vld [vmem:[%s3606_s1 + $0x78] ss:$12 sps:$4 sm:$0xff]  }
 0x1f8   :  { %2784 = vrcp.f32 %v555_v58  ;;  %v2720_v58 = vld [vmem:[%s3606_s1 + $0x80] ss:$12 sps:$4 sm:$0xff]  }
 0x203   :  { %v2783_v61 = vpop.eup %2782 }
 0x204   :  { %v558_v63 = vmul.f32 %v2783_v61, %v539_v59  ;;  %v3272_v59 = vld [vmem:[%s3606_s1 + $0x64] ss:$12 sps:$4 sm:$0xff]   ;;  %v3278_v61 = vld [vmem:[%s3606_s1 + $0x60] ss:$12 sps:$4 sm:$0xff]  }
 0x205   :  { %v2785_v12 = vpop.eup %2784 }
 0x206   :  { %v559_v10 = vadd.f32 %v2213_v62, %v558_v63  ;;  %v561_v15 = vsub.f32 1.0, %v2785_v12  ;;  %v563_v23 = vmul.f32 %v2785_v12, %v3078_v27  ;;  %v2724_v62 = vld [vmem:[%s3606_s1 + $0x68] ss:$12 sps:$4 sm:$0xff]   ;;  %v3287_v63 = vld [vmem:[%s3606_s1 + $0x4c] ss:$12 sps:$4 sm:$0xff]  }
 0x207   :  { %v2728_v12 = vld [vmem:[%s3606_s1 + $0x50] ss:$12 sps:$4 sm:$0xff]  }
 0x208   :  { %2786 = vtanh.f32 %v559_v10  ;;  %v3293_v10 = vld [vmem:[%s3606_s1 + $0x48] ss:$12 sps:$4 sm:$0xff]  }
 0x215   :  { %v2787_v18 = vpop.eup %2786 }
 0x216   :  { %v562_v21 = vmul.f32 %v2787_v18, %v561_v15  ;;  %v3303_v15 = vld [vmem:[%s3606_s1 + $0x34] ss:$12 sps:$4 sm:$0xff]   ;;  %v3309_v18 = vld [vmem:[%s3606_s1 + $0x30] ss:$12 sps:$4 sm:$0xff]  }
 0x218   :  { %v3150_v24 = vadd.f32 %v563_v23, %v562_v21  ;;  %v2732_v21 = vld [vmem:[%s3606_s1 + $0x38] ss:$12 sps:$4 sm:$0xff]   ;;  %v3319_v23 = vld [vmem:[%s3606_s1 + $0x1c] ss:$12 sps:$4 sm:$0xff]  }
 0x21a   :  { %2240 = vst [vmem:[%s3609_s3 + $0x8] sm:$0xff] %v3150_v24  ;;  %v571_v25 = vpack.c.bf16 %v3150_v24, %v3150_v24 }
 0x21c   :  { %765 = vmatmul.mubr.bf16.vlgmr.msra.gmra.mxu0 %v571_v25  ;;  %2550 = vmatmul.mubr.bf16.vlgmr.msra.gmra.mxu1 %v571_v25  ;;  %v2736_v25 = vld [vmem:[%s3606_s1 + $0x20] ss:$12 sps:$4 sm:$0xff]  }
 0x21d   :  { %1002 = vmatpush1.bf16.msra.mxu0 %v2881_v3  ;;  %1033 = vmatprep.mubr.bf16.mxu0 %v2849_v2 }
 0x21e   :  { %1003 = vmatprep.subr.bf16.mxu0 %v2889_v4  ;;  %2569 = vmatprep.mubr.msk.bf16.mxu1 %vm2850_vm0, %v2848_v1  ;;  %v2704_v4 = vld [vmem:[%s3606_s1 + $0xb0] ss:$12 sps:$4 sm:$0xff]  }
 0x21f   :  { %2554 = vmatpush3.bf16.msra.mxu1 %v2704_v4  ;;  %v3335_v4 = vld [vmem:[%s3606_s1 + $0x4] ss:$12 sps:$4 sm:$0xff]  }
 0x220   :  { %2555 = vmatprep.subr.bf16.mxu1 %v2848_v1 }
 0x221   :  { %1004 = vmatpush1.bf16.msra.mxu0 %v2895_v5  ;;  %v2705_v5 = vld [vmem:[%s3606_s1 + $0x98] ss:$12 sps:$4 sm:$0xff]  }
 0x222   :  { %1005 = vmatprep.subr.bf16.mxu0 %v2901_v6  ;;  %v2706_v6 = vld [vmem:[%s3606_s1 + $0x80] ss:$12 sps:$4 sm:$0xff]  }
 0x223   :  { %2556 = vmatpush3.bf16.msra.mxu1 %v2705_v5  ;;  %v3341_v5 = vld [vmem:[%s3606_s1] ss:$12 sps:$4 sm:$0xff]  }
 0x224   :  { %2557 = vmatprep.subr.bf16.mxu1 %v2848_v1 }
 0x225   :  { %1006 = vmatpush1.bf16.msra.mxu0 %v2907_v7  ;;  %v2708_v7 = vld [vmem:[%s3606_s1 + $0x50] ss:$12 sps:$4 sm:$0xff]  }
 0x226   :  { %1007 = vmatprep.subr.bf16.mxu0 %v2913_v8  ;;  %v2709_v8 = vld [vmem:[%s3606_s1 + $0x38] ss:$12 sps:$4 sm:$0xff]  }
 0x227   :  { %2558 = vmatpush3.bf16.msra.mxu1 %v2706_v6  ;;  %v2740_v6 = vld [vmem:[%s3606_s1 + $0x8] ss:$12 sps:$4 sm:$0xff]  }
 0x228   :  { %2559 = vmatprep.subr.bf16.mxu1 %v2848_v1 }
 0x229   :  { %1008 = vmatpush1.bf16.msra.mxu0 %v2918_v9  ;;  %v2710_v9 = vld [vmem:[%s3606_s1 + $0x20] ss:$12 sps:$4 sm:$0xff]  }
 0x22a   :  { %1009 = vmatprep.subr.bf16.mxu0 %v2928_v11  ;;  %v2711_v11 = vld [vmem:[%s3606_s1 + $0x8] ss:$12 sps:$4 sm:$0xff]  }
 0x22d   :  { %1010 = vmatpush1.bf16.msra.mxu0 %v2938_v13  ;;  %v2241_v13 = vld [vmem:[%s3608_s0 + $0x30] sm:$0xff] }
 0x22e   :  { %1011 = vmatprep.subr.bf16.mxu0 %v2944_v14 }
 0x231   :  { %1012 = vmatpush1.bf16.msra.mxu0 %v2952_v16 }
 0x232   :  { %1013 = vmatprep.subr.bf16.mxu0 %v2957_v17 }
 0x235   :  { %1014 = vmatpush1.bf16.msra.mxu0 %v2968_v19 }
 0x236   :  { %1015 = vmatprep.subr.bf16.mxu0 %v2973_v20 }
 0x239   :  { %1016 = vmatpush1.bf16.msra.mxu0 %v2984_v22 }
 0x23a   :  { %1270 = vmatprep.subr.bf16.mxu0 %v2874_v0  ;;  %v2707_v0 = vld [vmem:[%s3606_s1 + $0x68] ss:$12 sps:$4 sm:$0xff]  }
 0x23b   :  { %2560 = vmatpush3.bf16.msra.mxu1 %v2707_v0  ;;  %v2271_v0 = vld [vmem:[%s3608_s0 + $0x48] sm:$0xff] }
 0x23c   :  { %2561 = vmatprep.subr.bf16.mxu1 %v2848_v1 }
 0x23f   :  { %2562 = vmatpush3.bf16.msra.mxu1 %v2708_v7 }
 0x240   :  { %2563 = vmatprep.subr.bf16.mxu1 %v2848_v1 }
 0x243   :  { %2564 = vmatpush3.bf16.msra.mxu1 %v2709_v8 }
 0x244   :  { %2565 = vmatprep.subr.bf16.mxu1 %v2848_v1 }
 0x247   :  { %2566 = vmatpush3.bf16.msra.mxu1 %v2710_v9 }
 0x248   :  { %2567 = vmatprep.subr.bf16.mxu1 %v2848_v1 }
 0x24b   :  { %2568 = vmatpush3.bf16.msra.mxu1 %v2711_v11 }
 0x24c   :  { %2573 = vmatprep.subr.bf16.mxu1 %v2848_v1 }
 0x2dc   :  { %v766_v14 = vpop.f32.mrf.mxu0  ;;  %v807_v16 = vpop.f32.mrf.mxu1 }
 0x2dd   :  { %v767_v17 = vadd.f32 %v766_v14, %v3060_v38  ;;  %v808_v40 = vadd.f32 %v807_v16, %v3072_v60 }
 0x2de   :  { %v768_v19 = vpop.f32.mrf.mxu0  ;;  %v2551_v20 = vpop.f32.mrf.mxu1 }
 0x2df   :  { %v813_v22 = vadd.f32 %v2241_v13, %v767_v17  ;;  %v769_v29 = vadd.f32 %v768_v19, %v3066_v43 }
 0x2e0   :  { %v770_v26 = vpop.f32.mrf.mxu0  ;;  %v810_v27 = vpop.f32.mrf.mxu1 }
 0x2e1   :  { %v2268_v28 = vmul.f32 -1.442695, %v813_v22  ;;  %v820_v33 = vadd.f32 %v2242_v30, %v769_v29  ;;  %v2272_v22 = vld [vmem:[%s3608_s0 + $0x50] sm:$0xff] }
 0x2e2   :  { %v771_v31 = vpop.f32.mrf.mxu0  ;;  %v2552_v32 = vpop.f32.mrf.mxu1 }
 0x2e3   :  { %2788 = vpow2.f32 %v2268_v28  ;;  %v2269_v34 = vmul.f32 -1.442695, %v820_v33 }
 0x2e5   :  { %2790 = vpow2.f32 %v2269_v34 }
 0x2f0   :  { %v2789_v35 = vpop.eup %2788 }
 0x2f1   :  { %v817_v36 = vadd.f32 1.0, %v2789_v35 }
 0x2f2   :  { %v2791_v37 = vpop.eup %2790 }
 0x2f3   :  { %2792 = vrcp.f32 %v817_v36  ;;  %v824_v39 = vadd.f32 1.0, %v2791_v37  ;;  %v2273_v36 = vld [vmem:[%s3608_s0 + $0x58] sm:$0xff] }
 0x2f5   :  { %2794 = vrcp.f32 %v824_v39 }
 0x300   :  { %v2793_v41 = vpop.eup %2792 }
 0x301   :  { %v827_v44 = vmul.f32 %v2793_v41, %v808_v40 }
 0x302   :  { %v2795_v46 = vpop.eup %2794 }
 0x303   :  { %v828_v45 = vadd.f32 %v2243_v42, %v827_v44  ;;  %v830_v47 = vsub.f32 1.0, %v2795_v46  ;;  %v832_v50 = vmul.f32 %v2795_v46, %v3150_v24  ;;  %v3325_v24 = vld [vmem:[%s3606_s1 + $0x18] ss:$12 sps:$4 sm:$0xff]  }
 0x305   :  { %2796 = vtanh.f32 %v828_v45 }
 0x312   :  { %v2797_v48 = vpop.eup %2796 }
 0x313   :  { %v831_v49 = vmul.f32 %v2797_v48, %v830_v47  ;;  %v3377_v48 = vld [vmem:[%s3606_s1 + $0xac] ss:$12 sps:$4 sm:$0xff]  }
 0x315   :  { %v3222_v51 = vadd.f32 %v832_v50, %v831_v49  ;;  %v3382_v49 = vld [vmem:[%s3606_s1 + $0xa8] ss:$12 sps:$4 sm:$0xff]   ;;  %v2744_v50 = vld [vmem:[%s3606_s1 + $0xb0] ss:$12 sps:$4 sm:$0xff]  }
 0x317   :  { %2270 = vst [vmem:[%s3609_s3 + $0x10] sm:$0xff] %v3222_v51  ;;  %v840_v52 = vpack.c.bf16 %v3222_v51, %v3222_v51 }
 0x319   :  { %1034 = vmatmul.mubr.bf16.vlgmr.msra.gmra.mxu0 %v840_v52  ;;  %2570 = vmatmul.mubr.bf16.vlgmr.msra.gmra.mxu1 %v840_v52  ;;  %v2746_v52 = vld [vmem:[%s3606_s1 + $0x80] ss:$12 sps:$4 sm:$0xff]  }
 0x31a   :  { %1271 = vmatpush1.bf16.msra.mxu0 %v2881_v3  ;;  %1302 = vmatprep.mubr.bf16.mxu0 %v2849_v2  ;;  %v3246_v3 = vld [vmem:[%s3606_s1 + $0x90] ss:$12 sps:$4 sm:$0xff]  }
 0x31b   :  { %2589 = vmatprep.mubr.msk.bf16.mxu1 %vm2850_vm0, %v2848_v1  ;;  %2574 = vmatpush3.bf16.msra.mxu1 %v2712_v53  ;;  %v2747_v53 = vld [vmem:[%s3606_s1 + $0x68] ss:$12 sps:$4 sm:$0xff]  }
 0x31c   :  { %2575 = vmatprep.subr.bf16.mxu1 %v2848_v1  ;;  %1272 = vmatprep.subr.bf16.mxu0 %v3240_v54 }
 0x31e   :  { %1273 = vmatpush1.bf16.msra.mxu0 %v3246_v3 }
 0x31f   :  { %2576 = vmatpush3.bf16.msra.mxu1 %v2716_v55  ;;  %1274 = vmatprep.subr.bf16.mxu0 %v3256_v56  ;;  %v2748_v55 = vld [vmem:[%s3606_s1 + $0x50] ss:$12 sps:$4 sm:$0xff]  }
 0x320   :  { %2577 = vmatprep.subr.bf16.mxu1 %v2848_v1 }
 0x322   :  { %1275 = vmatpush1.bf16.msra.mxu0 %v3262_v57 }
 0x323   :  { %2578 = vmatpush3.bf16.msra.mxu1 %v2720_v58  ;;  %1276 = vmatprep.subr.bf16.mxu0 %v3272_v59  ;;  %v2749_v58 = vld [vmem:[%s3606_s1 + $0x38] ss:$12 sps:$4 sm:$0xff]  }
 0x324   :  { %2579 = vmatprep.subr.bf16.mxu1 %v2848_v1 }
 0x326   :  { %1277 = vmatpush1.bf16.msra.mxu0 %v3278_v61 }
 0x327   :  { %2580 = vmatpush3.bf16.msra.mxu1 %v2724_v62  ;;  %1278 = vmatprep.subr.bf16.mxu0 %v3287_v63  ;;  %v2750_v62 = vld [vmem:[%s3606_s1 + $0x20] ss:$12 sps:$4 sm:$0xff]  }
 0x328   :  { %2581 = vmatprep.subr.bf16.mxu1 %v2848_v1 }
 0x32a   :  { %1279 = vmatpush1.bf16.msra.mxu0 %v3293_v10 }
 0x32b   :  { %2582 = vmatpush3.bf16.msra.mxu1 %v2728_v12  ;;  %1280 = vmatprep.subr.bf16.mxu0 %v3303_v15  ;;  %v2751_v12 = vld [vmem:[%s3606_s1 + $0x8] ss:$12 sps:$4 sm:$0xff]  }
 0x32c   :  { %2583 = vmatprep.subr.bf16.mxu1 %v2848_v1 }
 0x32e   :  { %1281 = vmatpush1.bf16.msra.mxu0 %v3309_v18 }
 0x32f   :  { %2584 = vmatpush3.bf16.msra.mxu1 %v2732_v21  ;;  %1282 = vmatprep.subr.bf16.mxu0 %v3319_v23  ;;  %v2301_v21 = vld [vmem:[%s3608_s0 + $0x60] sm:$0xff] }
 0x330   :  { %2585 = vmatprep.subr.bf16.mxu1 %v2848_v1 }
 0x332   :  { %1283 = vmatpush1.bf16.msra.mxu0 %v3325_v24 }
 0x333   :  { %2586 = vmatpush3.bf16.msra.mxu1 %v2736_v25  ;;  %1284 = vmatprep.subr.bf16.mxu0 %v3335_v4 }
 0x334   :  { %2587 = vmatprep.subr.bf16.mxu1 %v2848_v1 }
 0x336   :  { %1285 = vmatpush1.bf16.msra.mxu0 %v3341_v5 }
 0x337   :  { %2588 = vmatpush3.bf16.msra.mxu1 %v2740_v6  ;;  %1539 = vmatprep.subr.bf16.mxu0 %v3377_v48 }
 0x338   :  { %2593 = vmatprep.subr.bf16.mxu1 %v2848_v1 }
 0x3d9   :  { %v1035_v7 = vpop.f32.mrf.mxu0  ;;  %v1076_v8 = vpop.f32.mrf.mxu1 }
 0x3da   :  { %v1036_v9 = vadd.f32 %v1035_v7, %v3060_v38  ;;  %v1077_v34 = vadd.f32 %v1076_v8, %v3072_v60 }
 0x3db   :  { %v1037_v11 = vpop.f32.mrf.mxu0  ;;  %v2571_v13 = vpop.f32.mrf.mxu1 }
 0x3dc   :  { %v1082_v14 = vadd.f32 %v2271_v0, %v1036_v9  ;;  %v1038_v20 = vadd.f32 %v1037_v11, %v3066_v43 }
 0x3dd   :  { %v1039_v16 = vpop.f32.mrf.mxu0  ;;  %v1079_v17 = vpop.f32.mrf.mxu1 }
 0x3de   :  { %v2298_v19 = vmul.f32 -1.442695, %v1082_v14  ;;  %v1089_v28 = vadd.f32 %v2272_v22, %v1038_v20  ;;  %v2302_v17 = vld [vmem:[%s3608_s0 + $0x68] sm:$0xff] }
 0x3df   :  { %v1040_v26 = vpop.f32.mrf.mxu0  ;;  %v2572_v27 = vpop.f32.mrf.mxu1 }
 0x3e0   :  { %2798 = vpow2.f32 %v2298_v19  ;;  %v2299_v29 = vmul.f32 -1.442695, %v1089_v28 }
 0x3e2   :  { %2800 = vpow2.f32 %v2299_v29 }
 0x3ed   :  { %v2799_v30 = vpop.eup %2798 }
 0x3ee   :  { %v1086_v31 = vadd.f32 1.0, %v2799_v30 }
 0x3ef   :  { %v2801_v32 = vpop.eup %2800 }
 0x3f0   :  { %2802 = vrcp.f32 %v1086_v31  ;;  %v1093_v33 = vadd.f32 1.0, %v2801_v32 }
 0x3f2   :  { %2804 = vrcp.f32 %v1093_v33  ;;  %v2303_v33 = vld [vmem:[%s3608_s0 + $0x70] sm:$0xff] }
 0x3fd   :  { %v2803_v35 = vpop.eup %2802 }
 0x3fe   :  { %v1096_v37 = vmul.f32 %v2803_v35, %v1077_v34 }
 0x3ff   :  { %v2805_v40 = vpop.eup %2804 }
 0x400   :  { %v1097_v39 = vadd.f32 %v2273_v36, %v1096_v37  ;;  %v1099_v41 = vsub.f32 1.0, %v2805_v40  ;;  %v1101_v45 = vmul.f32 %v2805_v40, %v3222_v51  ;;  %v2745_v51 = vld [vmem:[%s3606_s1 + $0x98] ss:$12 sps:$4 sm:$0xff]  }
 0x402   :  { %2806 = vtanh.f32 %v1097_v39 }
 0x40f   :  { %v2807_v42 = vpop.eup %2806 }
 0x410   :  { %v1100_v44 = vmul.f32 %v2807_v42, %v1099_v41 }
 0x412   :  { %v3363_v46 = vadd.f32 %v1101_v45, %v1100_v44  ;;  %v2752_v45 = vld [vmem:[%s3606_s1 + $0xb0] ss:$12 sps:$4 sm:$0xff]  }
 0x414   :  { %2300 = vst [vmem:[%s3609_s3 + $0x18] sm:$0xff] %v3363_v46  ;;  %v1109_v47 = vpack.c.bf16 %v3363_v46, %v3363_v46 }
 0x416   :  { %1303 = vmatmul.mubr.bf16.vlgmr.msra.gmra.mxu0 %v1109_v47  ;;  %2590 = vmatmul.mubr.bf16.vlgmr.msra.gmra.mxu1 %v1109_v47  ;;  %v2754_v47 = vld [vmem:[%s3606_s1 + $0x80] ss:$12 sps:$4 sm:$0xff]  }
 0x417   :  { %1571 = vmatprep.mubr.bf16.mxu0 %v2849_v2  ;;  %2609 = vmatprep.mubr.msk.bf16.mxu1 %vm2850_vm0, %v2848_v1 }
 0x418   :  { %1540 = vmatpush1.bf16.msra.mxu0 %v3382_v49  ;;  %2594 = vmatpush3.bf16.msra.mxu1 %v2744_v50  ;;  %v2756_v50 = vld [vmem:[%s3606_s1 + $0x50] ss:$12 sps:$4 sm:$0xff]  }
 0x419   :  { %1541 = vmatprep.subr.bf16.mxu0 %v3240_v54  ;;  %2595 = vmatprep.subr.bf16.mxu1 %v2848_v1 }
 0x41c   :  { %1542 = vmatpush1.bf16.msra.mxu0 %v3246_v3  ;;  %2596 = vmatpush3.bf16.msra.mxu1 %v2745_v51  ;;  %v2757_v51 = vld [vmem:[%s3606_s1 + $0x38] ss:$12 sps:$4 sm:$0xff]  }
 0x41d   :  { %1543 = vmatprep.subr.bf16.mxu0 %v3256_v56  ;;  %2597 = vmatprep.subr.bf16.mxu1 %v2848_v1 }
 0x420   :  { %1544 = vmatpush1.bf16.msra.mxu0 %v3262_v57  ;;  %2598 = vmatpush3.bf16.msra.mxu1 %v2746_v52  ;;  %v2758_v52 = vld [vmem:[%s3606_s1 + $0x20] ss:$12 sps:$4 sm:$0xff]  }
 0x421   :  { %1545 = vmatprep.subr.bf16.mxu0 %v3272_v59  ;;  %2599 = vmatprep.subr.bf16.mxu1 %v2848_v1 }
 0x424   :  { %1546 = vmatpush1.bf16.msra.mxu0 %v3278_v61  ;;  %2600 = vmatpush3.bf16.msra.mxu1 %v2747_v53  ;;  %v2759_v53 = vld [vmem:[%s3606_s1 + $0x8] ss:$12 sps:$4 sm:$0xff]  }
 0x425   :  { %1547 = vmatprep.subr.bf16.mxu0 %v3287_v63  ;;  %2601 = vmatprep.subr.bf16.mxu1 %v2848_v1 }
 0x428   :  { %1548 = vmatpush1.bf16.msra.mxu0 %v3293_v10  ;;  %2602 = vmatpush3.bf16.msra.mxu1 %v2748_v55  ;;  %v2331_v55 = vld [vmem:[%s3608_s0 + $0x78] sm:$0xff] }
 0x429   :  { %1549 = vmatprep.subr.bf16.mxu0 %v3303_v15  ;;  %2603 = vmatprep.subr.bf16.mxu1 %v2848_v1 }
 0x42c   :  { %1550 = vmatpush1.bf16.msra.mxu0 %v3309_v18  ;;  %2604 = vmatpush3.bf16.msra.mxu1 %v2749_v58 }
 0x42d   :  { %1551 = vmatprep.subr.bf16.mxu0 %v3319_v23  ;;  %2605 = vmatprep.subr.bf16.mxu1 %v2848_v1 }
 0x430   :  { %1552 = vmatpush1.bf16.msra.mxu0 %v3325_v24  ;;  %2606 = vmatpush3.bf16.msra.mxu1 %v2750_v62 }
 0x431   :  { %1553 = vmatprep.subr.bf16.mxu0 %v3335_v4  ;;  %2607 = vmatprep.subr.bf16.mxu1 %v2848_v1 }
 0x434   :  { %1554 = vmatpush1.bf16.msra.mxu0 %v3341_v5  ;;  %2608 = vmatpush3.bf16.msra.mxu1 %v2751_v12 }
 0x435   :  { %1808 = vmatprep.subr.bf16.mxu0 %v3377_v48  ;;  %2613 = vmatprep.subr.bf16.mxu1 %v2848_v1 }
 0x4d6   :  { %v1304_v25 = vpop.f32.mrf.mxu0  ;;  %v1345_v6 = vpop.f32.mrf.mxu1 }
 0x4d7   :  { %v1305_v0 = vadd.f32 %v1304_v25, %v3060_v38  ;;  %v1346_v31 = vadd.f32 %v1345_v6, %v3072_v60 }
 0x4d8   :  { %v1306_v7 = vpop.f32.mrf.mxu0  ;;  %v2591_v8 = vpop.f32.mrf.mxu1 }
 0x4d9   :  { %v1351_v9 = vadd.f32 %v2301_v21, %v1305_v0  ;;  %v1307_v16 = vadd.f32 %v1306_v7, %v3066_v43 }
 0x4da   :  { %v1308_v11 = vpop.f32.mrf.mxu0  ;;  %v1348_v13 = vpop.f32.mrf.mxu1 }
 0x4db   :  { %v2328_v14 = vmul.f32 -1.442695, %v1351_v9  ;;  %v1358_v22 = vadd.f32 %v2302_v17, %v1307_v16  ;;  %v2332_v11 = vld [vmem:[%s3608_s0 + $0x80] sm:$0xff] }
 0x4dc   :  { %v1309_v19 = vpop.f32.mrf.mxu0  ;;  %v2592_v20 = vpop.f32.mrf.mxu1 }
 0x4dd   :  { %2808 = vpow2.f32 %v2328_v14  ;;  %v2329_v26 = vmul.f32 -1.442695, %v1358_v22 }
 0x4df   :  { %2810 = vpow2.f32 %v2329_v26 }
 0x4ea   :  { %v2809_v27 = vpop.eup %2808 }
 0x4eb   :  { %v1355_v28 = vadd.f32 1.0, %v2809_v27 }
 0x4ec   :  { %v2811_v29 = vpop.eup %2810 }
 0x4ed   :  { %2812 = vrcp.f32 %v1355_v28  ;;  %v1362_v30 = vadd.f32 1.0, %v2811_v29  ;;  %v2333_v29 = vld [vmem:[%s3608_s0 + $0x88] sm:$0xff] }
 0x4ef   :  { %2814 = vrcp.f32 %v1362_v30 }
 0x4fa   :  { %v2813_v32 = vpop.eup %2812 }
 0x4fb   :  { %v1365_v34 = vmul.f32 %v2813_v32, %v1346_v31 }
 0x4fc   :  { %v2815_v36 = vpop.eup %2814 }
 0x4fd   :  { %v1366_v35 = vadd.f32 %v2303_v33, %v1365_v34  ;;  %v1368_v37 = vsub.f32 1.0, %v2815_v36  ;;  %v1370_v41 = vmul.f32 %v2815_v36, %v3363_v46  ;;  %v2753_v46 = vld [vmem:[%s3606_s1 + $0x98] ss:$12 sps:$4 sm:$0xff]  }
 0x4ff   :  { %2816 = vtanh.f32 %v1366_v35 }
 0x50c   :  { %v2817_v39 = vpop.eup %2816 }
 0x50d   :  { %v1369_v40 = vmul.f32 %v2817_v39, %v1368_v37 }
 0x50f   :  { %v3446_v42 = vadd.f32 %v1370_v41, %v1369_v40 }
 0x511   :  { %2330 = vst [vmem:[%s3609_s3 + $0x20] sm:$0xff] %v3446_v42  ;;  %v1378_v44 = vpack.c.bf16 %v3446_v42, %v3446_v42 }
 0x513   :  { %1572 = vmatmul.mubr.bf16.vlgmr.msra.gmra.mxu0 %v1378_v44  ;;  %2610 = vmatmul.mubr.bf16.vlgmr.msra.gmra.mxu1 %v1378_v44 }
 0x514   :  { %1809 = vmatpush1.bf16.msra.mxu0 %v3382_v49  ;;  %1840 = vmatprep.mubr.bf16.mxu0 %v2849_v2 }
 0x515   :  { %1810 = vmatprep.subr.bf16.mxu0 %v3240_v54  ;;  %2629 = vmatprep.mubr.msk.bf16.mxu1 %vm2850_vm0, %v2848_v1 }
 0x516   :  { %2614 = vmatpush3.bf16.msra.mxu1 %v2752_v45 }
 0x517   :  { %2615 = vmatprep.subr.bf16.mxu1 %v2848_v1 }
 0x518   :  { %1811 = vmatpush1.bf16.msra.mxu0 %v3246_v3 }
 0x519   :  { %1812 = vmatprep.subr.bf16.mxu0 %v3256_v56 }
 0x51a   :  { %2616 = vmatpush3.bf16.msra.mxu1 %v2753_v46 }
 0x51b   :  { %2617 = vmatprep.subr.bf16.mxu1 %v2848_v1 }
 0x51c   :  { %1813 = vmatpush1.bf16.msra.mxu0 %v3262_v57 }
 0x51d   :  { %1814 = vmatprep.subr.bf16.mxu0 %v3272_v59 }
 0x51e   :  { %2618 = vmatpush3.bf16.msra.mxu1 %v2754_v47 }
 0x51f   :  { %2619 = vmatprep.subr.bf16.mxu1 %v2848_v1 }
 0x520   :  { %1815 = vmatpush1.bf16.msra.mxu0 %v3278_v61 }
 0x521   :  { %1816 = vmatprep.subr.bf16.mxu0 %v3287_v63 }
 0x524   :  { %1817 = vmatpush1.bf16.msra.mxu0 %v3293_v10 }
 0x525   :  { %1818 = vmatprep.subr.bf16.mxu0 %v3303_v15 }
 0x528   :  { %1819 = vmatpush1.bf16.msra.mxu0 %v3309_v18 }
 0x529   :  { %1820 = vmatprep.subr.bf16.mxu0 %v3319_v23 }
 0x52c   :  { %1821 = vmatpush1.bf16.msra.mxu0 %v3325_v24 }
 0x52d   :  { %1822 = vmatprep.subr.bf16.mxu0 %v3335_v4 }
 0x530   :  { %1823 = vmatpush1.bf16.msra.mxu0 %v3341_v5 }
 0x531   :  { %2077 = vmatprep.subr.bf16.mxu0 %v3377_v48  ;;  %v2755_v48 = vld [vmem:[%s3606_s1 + $0x68] ss:$12 sps:$4 sm:$0xff]  }
 0x532   :  { %2620 = vmatpush3.bf16.msra.mxu1 %v2755_v48 }
 0x533   :  { %2621 = vmatprep.subr.bf16.mxu1 %v2848_v1 }
 0x536   :  { %2622 = vmatpush3.bf16.msra.mxu1 %v2756_v50 }
 0x537   :  { %2623 = vmatprep.subr.bf16.mxu1 %v2848_v1 }
 0x53a   :  { %2624 = vmatpush3.bf16.msra.mxu1 %v2757_v51 }
 0x53b   :  { %2625 = vmatprep.subr.bf16.mxu1 %v2848_v1 }
 0x53e   :  { %2626 = vmatpush3.bf16.msra.mxu1 %v2758_v52 }
 0x53f   :  { %2627 = vmatprep.subr.bf16.mxu1 %v2848_v1 }
 0x542   :  { %2628 = vmatpush3.bf16.msra.mxu1 %v2759_v53 }
 0x543   :  { %2633 = vmatprep.subr.bf16.mxu1 %v2848_v1 }
 0x5d3   :  { %v1573_v58 = vpop.f32.mrf.mxu0  ;;  %v1614_v62 = vpop.f32.mrf.mxu1 }
 0x5d4   :  { %v1574_v12 = vadd.f32 %v1573_v58, %v3060_v38  ;;  %v1615_v27 = vadd.f32 %v1614_v62, %v3072_v60  ;;  %v2363_v58 = vld [vmem:[%s3608_s0 + $0xa0] sm:$0xff] }
 0x5d5   :  { %v1575_v21 = vpop.f32.mrf.mxu0  ;;  %v2611_v25 = vpop.f32.mrf.mxu1 }
 0x5d6   :  { %v1620_v6 = vadd.f32 %v2331_v55, %v1574_v12  ;;  %v1576_v9 = vadd.f32 %v1575_v21, %v3066_v43 }
 0x5d7   :  { %v1577_v0 = vpop.f32.mrf.mxu0  ;;  %v1617_v7 = vpop.f32.mrf.mxu1 }
 0x5d8   :  { %v2358_v8 = vmul.f32 -1.442695, %v1620_v6  ;;  %v1627_v16 = vadd.f32 %v2332_v11, %v1576_v9  ;;  %v2391_v11 = vld [vmem:[%s3608_s0 + $0xa8] sm:$0xff] }
 0x5d9   :  { %v1578_v13 = vpop.f32.mrf.mxu0  ;;  %v2612_v14 = vpop.f32.mrf.mxu1 }
 0x5da   :  { %2818 = vpow2.f32 %v2358_v8  ;;  %v2359_v17 = vmul.f32 -1.442695, %v1627_v16 }
 0x5dc   :  { %2820 = vpow2.f32 %v2359_v17 }
 0x5e7   :  { %v2819_v19 = vpop.eup %2818 }
 0x5e8   :  { %v1624_v20 = vadd.f32 1.0, %v2819_v19 }
 0x5e9   :  { %v2821_v22 = vpop.eup %2820 }
 0x5ea   :  { %2822 = vrcp.f32 %v1624_v20  ;;  %v1631_v26 = vadd.f32 1.0, %v2821_v22 }
 0x5ec   :  { %2824 = vrcp.f32 %v1631_v26 }
 0x5f7   :  { %v2823_v28 = vpop.eup %2822 }
 0x5f8   :  { %v1634_v30 = vmul.f32 %v2823_v28, %v1615_v27 }
 0x5f9   :  { %v2825_v32 = vpop.eup %2824 }
 0x5fa   :  { %v1635_v31 = vadd.f32 %v2333_v29, %v1634_v30  ;;  %v1637_v33 = vsub.f32 1.0, %v2825_v32  ;;  %v1639_v36 = vmul.f32 %v2825_v32, %v3446_v42  ;;  %v2392_v29 = vld [vmem:[%s3608_s0 + $0xb0] sm:$0xff] }
 0x5fc   :  { %2826 = vtanh.f32 %v1635_v31 }
 0x609   :  { %v2827_v34 = vpop.eup %2826 }
 0x60a   :  { %v1638_v35 = vmul.f32 %v2827_v34, %v1637_v33 }
 0x60c   :  { %v3518_v37 = vadd.f32 %v1639_v36, %v1638_v35 }
 0x60e   :  { %2360 = vst [vmem:[%s3609_s3 + $0x28] sm:$0xff] %v3518_v37  ;;  %v1647_v39 = vpack.c.bf16 %v3518_v37, %v3518_v37 }
 0x610   :  { %1841 = vmatmul.mubr.bf16.vlgmr.msra.gmra.mxu0 %v1647_v39  ;;  %2630 = vmatmul.mubr.bf16.vlgmr.msra.gmra.mxu1 %v1647_v39 }
 0x611   :  { %2078 = vmatpush1.bf16.msra.mxu0 %v3382_v49  ;;  %2109 = vmatprep.mubr.bf16.mxu0 %v2849_v2  ;;  %v2760_v2 = vld [vmem:[%s3606_s1 + $0xb0] ss:$12 sps:$4 sm:$0xff]  }
 0x612   :  { %2079 = vmatprep.subr.bf16.mxu0 %v3240_v54  ;;  %2649 = vmatprep.mubr.msk.bf16.mxu1 %vm2850_vm0, %v2848_v1  ;;  %v2761_v54 = vld [vmem:[%s3606_s1 + $0x98] ss:$12 sps:$4 sm:$0xff]  }
 0x613   :  { %2634 = vmatpush3.bf16.msra.mxu1 %v2760_v2 }
 0x614   :  { %2635 = vmatprep.subr.bf16.mxu1 %v2848_v1 }
 0x615   :  { %2080 = vmatpush1.bf16.msra.mxu0 %v3246_v3  ;;  %v2762_v3 = vld [vmem:[%s3606_s1 + $0x80] ss:$12 sps:$4 sm:$0xff]  }
 0x616   :  { %2081 = vmatprep.subr.bf16.mxu0 %v3256_v56  ;;  %v2763_v56 = vld [vmem:[%s3606_s1 + $0x68] ss:$12 sps:$4 sm:$0xff]  }
 0x617   :  { %2636 = vmatpush3.bf16.msra.mxu1 %v2761_v54 }
 0x618   :  { %2637 = vmatprep.subr.bf16.mxu1 %v2848_v1 }
 0x619   :  { %2082 = vmatpush1.bf16.msra.mxu0 %v3262_v57  ;;  %v2764_v57 = vld [vmem:[%s3606_s1 + $0x50] ss:$12 sps:$4 sm:$0xff]  }
 0x61a   :  { %2083 = vmatprep.subr.bf16.mxu0 %v3272_v59  ;;  %v2765_v59 = vld [vmem:[%s3606_s1 + $0x38] ss:$12 sps:$4 sm:$0xff]  }
 0x61b   :  { %2638 = vmatpush3.bf16.msra.mxu1 %v2762_v3 }
 0x61c   :  { %2639 = vmatprep.subr.bf16.mxu1 %v2848_v1 }
 0x61d   :  { %2084 = vmatpush1.bf16.msra.mxu0 %v3278_v61  ;;  %v2766_v61 = vld [vmem:[%s3606_s1 + $0x20] ss:$12 sps:$4 sm:$0xff]  }
 0x61e   :  { %2085 = vmatprep.subr.bf16.mxu0 %v3287_v63  ;;  %v2767_v63 = vld [vmem:[%s3606_s1 + $0x8] ss:$12 sps:$4 sm:$0xff]  }
 0x61f   :  { %2640 = vmatpush3.bf16.msra.mxu1 %v2763_v56 }
 0x620   :  { %2641 = vmatprep.subr.bf16.mxu1 %v2848_v1 }
 0x621   :  { %2086 = vmatpush1.bf16.msra.mxu0 %v3293_v10  ;;  %v2361_v10 = vld [vmem:[%s3608_s0 + $0x90] sm:$0xff] }
 0x622   :  { %2087 = vmatprep.subr.bf16.mxu0 %v3303_v15 }
 0x623   :  { %2642 = vmatpush3.bf16.msra.mxu1 %v2764_v57 }
 0x624   :  { %2643 = vmatprep.subr.bf16.mxu1 %v2848_v1 }
 0x625   :  { %2088 = vmatpush1.bf16.msra.mxu0 %v3309_v18 }
 0x626   :  { %2089 = vmatprep.subr.bf16.mxu0 %v3319_v23 }
 0x627   :  { %2644 = vmatpush3.bf16.msra.mxu1 %v2765_v59 }
 0x628   :  { %2645 = vmatprep.subr.bf16.mxu1 %v2848_v1 }
 0x629   :  { %2090 = vmatpush1.bf16.msra.mxu0 %v3325_v24 }
 0x62a   :  { %2091 = vmatprep.subr.bf16.mxu0 %v3335_v4 }
 0x62b   :  { %2646 = vmatpush3.bf16.msra.mxu1 %v2766_v61 }
 0x62c   :  { %2647 = vmatprep.subr.bf16.mxu1 %v2848_v1  ;;  %v2362_v1 = vld [vmem:[%s3608_s0 + $0x98] sm:$0xff] }
 0x62d   :  { %2092 = vmatpush1.bf16.msra.mxu0 %v3341_v5 }
 0x62f   :  { %2648 = vmatpush3.bf16.msra.mxu1 %v2767_v63 }
 0x6d0   :  { %v1842_v15 = vpop.f32.mrf.mxu0  ;;  %v1883_v18 = vpop.f32.mrf.mxu1 }
 0x6d1   :  { %v1843_v23 = vadd.f32 %v1842_v15, %v3060_v38  ;;  %v1884_v53 = vadd.f32 %v1883_v18, %v3072_v60 }
 0x6d2   :  { %v1844_v24 = vpop.f32.mrf.mxu0  ;;  %v2631_v4 = vpop.f32.mrf.mxu1 }
 0x6d3   :  { %v1889_v5 = vadd.f32 %v2361_v10, %v1843_v23  ;;  %v1845_v42 = vadd.f32 %v1844_v24, %v3066_v43 }
 0x6d4   :  { %v1846_v49 = vpop.f32.mrf.mxu0  ;;  %v1886_v40 = vpop.f32.mrf.mxu1 }
 0x6d5   :  { %v2388_v41 = vmul.f32 -1.442695, %v1889_v5  ;;  %v1896_v46 = vadd.f32 %v2362_v1, %v1845_v42 }
 0x6d6   :  { %v1847_v44 = vpop.f32.mrf.mxu0  ;;  %v2632_v45 = vpop.f32.mrf.mxu1 }
 0x6d7   :  { %2828 = vpow2.f32 %v2388_v41  ;;  %v2389_v47 = vmul.f32 -1.442695, %v1896_v46 }
 0x6d9   :  { %2830 = vpow2.f32 %v2389_v47 }
 0x6e4   :  { %v2829_v48 = vpop.eup %2828 }
 0x6e5   :  { %v1893_v50 = vadd.f32 1.0, %v2829_v48 }
 0x6e6   :  { %v2831_v51 = vpop.eup %2830 }
 0x6e7   :  { %2832 = vrcp.f32 %v1893_v50  ;;  %v1900_v52 = vadd.f32 1.0, %v2831_v51 }
 0x6e9   :  { %2834 = vrcp.f32 %v1900_v52 }
 0x6f4   :  { %v2833_v55 = vpop.eup %2832 }
 0x6f5   :  { %v1903_v62 = vmul.f32 %v2833_v55, %v1884_v53 }
 0x6f6   :  { %v2835_v21 = vpop.eup %2834 }
 0x6f7   :  { %v1904_v12 = vadd.f32 %v2363_v58, %v1903_v62  ;;  %v1906_v25 = vsub.f32 1.0, %v2835_v21  ;;  %v1908_v7 = vmul.f32 %v2835_v21, %v3518_v37 }
 0x6f9   :  { %2836 = vtanh.f32 %v1904_v12 }
 0x706   :  { %v2837_v6 = vpop.eup %2836 }
 0x707   :  { %v1907_v0 = vmul.f32 %v2837_v6, %v1906_v25 }
 0x709   :  { %v1909_v8 = vadd.f32 %v1908_v7, %v1907_v0 }
 0x70b   :  { %2390 = vst [vmem:[%s3609_s3 + $0x30] sm:$0xff] %v1909_v8  ;;  %v1916_v9 = vpack.c.bf16 %v1909_v8, %v1909_v8 }
 0x70d   :  { %2110 = vmatmul.mubr.bf16.vlgmr.msra.gmra.mxu0 %v1916_v9  ;;  %2650 = vmatmul.mubr.bf16.vlgmr.msra.gmra.mxu1 %v1916_v9 }
 0x7cd   :  { %v2111_v13 = vpop.f32.mrf.mxu0  ;;  %v2152_v14 = vpop.f32.mrf.mxu1 }
 0x7ce   :  { %v2112_v16 = vadd.f32 %v2111_v13, %v3060_v38  ;;  %v2153_v37 = vadd.f32 %v2152_v14, %v3072_v60 }
 0x7cf   :  { %v2113_v17 = vpop.f32.mrf.mxu0  ;;  %v2651_v19 = vpop.f32.mrf.mxu1 }
 0x7d0   :  { %v2158_v20 = vadd.f32 %v2391_v11, %v2112_v16  ;;  %v2114_v28 = vadd.f32 %v2113_v17, %v3066_v43  ;;  %v2393_v43 = vld [vmem:[%s3608_s0 + $0xb8] sm:$0xff] }
 0x7d1   :  { %v2115_v22 = vpop.f32.mrf.mxu0  ;;  %v2155_v26 = vpop.f32.mrf.mxu1 }
 0x7d2   :  { %v2418_v27 = vmul.f32 -1.442695, %v2158_v20  ;;  %v2165_v32 = vadd.f32 %v2392_v29, %v2114_v28 }
 0x7d3   :  { %v2116_v30 = vpop.f32.mrf.mxu0  ;;  %v2652_v31 = vpop.f32.mrf.mxu1 }
 0x7d4   :  { %2838 = vpow2.f32 %v2418_v27  ;;  %v2419_v33 = vmul.f32 -1.442695, %v2165_v32 }
 0x7d6   :  { %2840 = vpow2.f32 %v2419_v33 }
 0x7e1   :  { %v2839_v34 = vpop.eup %2838 }
 0x7e2   :  { %v2162_v38 = vadd.f32 1.0, %v2839_v34 }
 0x7e3   :  { %v2841_v35 = vpop.eup %2840 }
 0x7e4   :  { %2842 = vrcp.f32 %v2162_v38  ;;  %v2169_v36 = vadd.f32 1.0, %v2841_v35 }
 0x7e6   :  { %2844 = vrcp.f32 %v2169_v36 }
 0x7f1   :  { %v2843_v39 = vpop.eup %2842 }
 0x7f2   :  { %v2172_v2 = vmul.f32 %v2843_v39, %v2153_v37 }
 0x7f3   :  { %v2845_v3 = vpop.eup %2844 }
 0x7f4   :  { %v2173_v54 = vadd.f32 %v2393_v43, %v2172_v2  ;;  %v2175_v56 = vsub.f32 1.0, %v2845_v3  ;;  %v2177_v61 = vmul.f32 %v2845_v3, %v1909_v8 }
 0x7f6   :  { %2846 = vtanh.f32 %v2173_v54 }
 0x803   :  { %v2847_v57 = vpop.eup %2846 }
 0x804   :  { %v2176_v59 = vmul.f32 %v2847_v57, %v2175_v56 }
 0x806   :  { %v2178_v63 = vadd.f32 %v2177_v61, %v2176_v59 }
 0x808   :  { %2420 = vst [vmem:[%s3609_s3 + $0x38] sm:$0xff] %v2178_v63 }

</bundles_post_ra>
